<compile_context>
chip_gen: v6e
topology: v6e:2x2x1
jax: 0.10.0
libtpu: 0.0.40
codegen_flags: <defaults>
</compile_context>

<pallas_src>
import jax
import jax.numpy as jnp
from jax.experimental import pallas as pl
from jax.experimental.pallas import tpu as pltpu


# ----------------------------- kernels --------------------------------------


def _mlp_resident_kernel(x_ref, w1_ref, b1_ref, w2_ref, b2_ref, o_ref):
    """Whole hidden dim per step; W1/W2 stay VMEM-resident across the grid."""
    # fc1: (tm, C) @ (C, H) -> f32; MXU sees the bf16 storage dtype.
    h = jnp.dot(x_ref[...], w1_ref[...], preferred_element_type=jnp.float32)
    h = h + b1_ref[...].astype(jnp.float32)
    # QuickGELU in f32 (sigmoid goes to the EUP slot, overlaps MXU work).
    h = h * jax.nn.sigmoid(1.702 * h)
    # fc2: cast activations back to the weight dtype for the MXU.
    out = jnp.dot(h.astype(w2_ref.dtype), w2_ref[...],
                  preferred_element_type=jnp.float32)
    o_ref[...] = (out + b2_ref[...].astype(jnp.float32)).astype(o_ref.dtype)


def _mlp_streaming_kernel(x_ref, w1_ref, b1_ref, w2_ref, b2_ref, o_ref, acc_ref):
    """Hidden dim streamed in blocks (axis j); f32 accumulator in VMEM."""
    j = pl.program_id(1)
    nj = pl.num_programs(1)

    @pl.when(j == 0)
    def _():
        acc_ref[...] = jnp.zeros_like(acc_ref)

    h = jnp.dot(x_ref[...], w1_ref[...], preferred_element_type=jnp.float32)
    h = h + b1_ref[...].astype(jnp.float32)
    h = h * jax.nn.sigmoid(1.702 * h)
    part = jnp.dot(h.astype(w2_ref.dtype), w2_ref[...],
                   preferred_element_type=jnp.float32)

    @pl.when(j < nj - 1)
    def _():
        acc_ref[...] += part

    # Fused epilogue: avoid an extra (tm, C) f32 store+load of the accumulator
    # on the last hidden block.
    @pl.when(j == nj - 1)
    def _():
        o_ref[...] = (acc_ref[...] + part
                      + b2_ref[...].astype(jnp.float32)).astype(o_ref.dtype)


# ----------------------------- tiling helpers -------------------------------


def _round_up(n, m):
    return ((n + m - 1) // m) * m


def _vmem_capacity_bytes():
    try:
        return int(pltpu.get_tpu_info().vmem_capacity_bytes)
    except Exception:
        return 64 * 1024 * 1024  # conservative (v7x per-TC VMEM)


def _choose_token_tile(seq, target):
    """Token tile: multiple of 16 (bf16 sublane packing); 256-aligned if big."""
    s16 = _round_up(seq, 16)
    if s16 <= target:
        return s16                      # whole (padded) sequence in one tile
    tm = max(16, (target // 16) * 16)
    if tm >= 256:
        tm = (tm // 256) * 256          # v6e/v7x MXU is 2x256x256
    return tm


def _pick_divisor_tile(dim, target, align):
    """Largest aligned divisor of `dim` <= target; otherwise the full dim."""
    t = min(target, dim)
    for cand in range(t, align - 1, -1):
        if dim % cand == 0 and cand % align == 0:
            return cand
    return dim                          # full dim is always a legal block


# ----------------------------- wrapper ---------------------------------------


def qwen2_vision_mlp(x, w1, b1, w2, b2, *, block_tokens=None, block_hidden=512,
                     weight_resident=None):
    """x: (seq, in_features). w1: (C, H), b1: (H,), w2: (H, C), b2: (C,)."""
    S, C = x.shape
    Cw, H = w1.shape
    assert Cw == C and w2.shape == (H, C) and b1.shape == (H,) and b2.shape == (C,)

    vmem_cap = _vmem_capacity_bytes()
    wbytes = w1.dtype.itemsize
    xbytes = x.dtype.itemsize

    # --- decide variant: keep W1+W2 fully VMEM-resident if they fit ----------
    tm_res = _choose_token_tile(S, block_tokens or 512)
    resident_need = (
        2 * (w1.size + w2.size + b1.size + b2.size) * wbytes   # weights (buffered)
        + 4 * tm_res * C * xbytes                              # x tile + out tile (dbuf)
        + 2 * tm_res * H * 4                                   # f32 intermediates
    )
    if weight_resident is None:
        weight_resident = resident_need <= int(0.75 * vmem_cap)

    vmem_limit = int(vmem_cap * 0.9)
    b1_2d = b1.reshape(1, H)
    b2_2d = b2.reshape(1, C)

    if weight_resident:
        tm = tm_res
        S_pad = _round_up(S, tm)
        x_in = jnp.pad(x, ((0, S_pad - S), (0, 0))) if S_pad != S else x
        grid = (S_pad // tm,)

        cost = pl.CostEstimate(
            flops=4 * S_pad * C * H,
            transcendentals=S_pad * H,
            bytes_accessed=int((w1.size + w2.size + b1.size + b2.size) * wbytes
                               + 2 * S_pad * C * xbytes),
        )
        out = pl.pallas_call(
            _mlp_resident_kernel,
            out_shape=jax.ShapeDtypeStruct((S_pad, C), x.dtype),
            grid_spec=pltpu.PrefetchScalarGridSpec(
                num_scalar_prefetch=0,
                grid=grid,
                in_specs=[
                    pl.BlockSpec((tm, C), lambda i: (i, 0)),   # x tile
                    pl.BlockSpec((C, H), lambda i: (0, 0)),    # W1 (resident)
                    pl.BlockSpec((1, H), lambda i: (0, 0)),    # b1 (resident)
                    pl.BlockSpec((H, C), lambda i: (0, 0)),    # W2 (resident)
                    pl.BlockSpec((1, C), lambda i: (0, 0)),    # b2 (resident)
                ],
                out_specs=pl.BlockSpec((tm, C), lambda i: (i, 0)),
            ),
            compiler_params=pltpu.CompilerParams(
                dimension_semantics=("parallel",),
                vmem_limit_bytes=vmem_limit),
            cost_estimate=cost,
        )(x_in, w1, b1_2d, w2, b2_2d)
    else:
        # Hidden-streaming fallback (e.g. v7x 64 MiB VMEM at real sizes).
        # Large token tile keeps the per-step weight DMA below the MXU roofline.
        tm = _choose_token_tile(S, block_tokens or 768)
        th = _pick_divisor_tile(H, block_hidden, 128)
        S_pad = _round_up(S, tm)
        x_in = jnp.pad(x, ((0, S_pad - S), (0, 0))) if S_pad != S else x
        grid = (S_pad // tm, H // th)

        cost = pl.CostEstimate(
            flops=4 * S_pad * C * H,
            transcendentals=S_pad * H,
            bytes_accessed=int(grid[0] * (w1.size + w2.size + b1.size) * wbytes
                               + b2.size * wbytes + 2 * S_pad * C * xbytes),
        )
        out = pl.pallas_call(
            _mlp_streaming_kernel,
            out_shape=jax.ShapeDtypeStruct((S_pad, C), x.dtype),
            grid_spec=pltpu.PrefetchScalarGridSpec(
                num_scalar_prefetch=0,
                grid=grid,
                in_specs=[
                    pl.BlockSpec((tm, C), lambda i, j: (i, 0)),   # x tile (resident over j)
                    pl.BlockSpec((C, th), lambda i, j: (0, j)),   # W1 column block
                    pl.BlockSpec((1, th), lambda i, j: (0, j)),   # b1 block
                    pl.BlockSpec((th, C), lambda i, j: (j, 0)),   # W2 row block
                    pl.BlockSpec((1, C), lambda i, j: (0, 0)),    # b2 (resident)
                ],
                out_specs=pl.BlockSpec((tm, C), lambda i, j: (i, 0)),
                scratch_shapes=[pltpu.VMEM((tm, C), jnp.float32)],
            ),
            compiler_params=pltpu.CompilerParams(
                dimension_semantics=("parallel", "arbitrary"),
                vmem_limit_bytes=vmem_limit),
            cost_estimate=cost,
        )(x_in, w1, b1_2d, w2, b2_2d)

    return out[:S] if S_pad != S else out


# ----------------------------- reference & demo ------------------------------


def _reference(x, w1, b1, w2, b2):
    xf = x.astype(jnp.float32)
    h = xf @ w1.astype(jnp.float32) + b1.astype(jnp.float32)
    h = h * jax.nn.sigmoid(1.702 * h)
    return h @ w2.astype(jnp.float32) + b2.astype(jnp.float32)


if __name__ == "__main__":
    # Small shapes consistent with the module (mlp_ratio = 4).  seq=100 is
    # deliberately not 16-aligned to exercise the wrapper-side padding path.
    in_features = 128
    hidden_features = 512
    seq = 100

    key = jax.random.PRNGKey(0)
    kx, kw1, kb1, kw2, kb2 = jax.random.split(key, 5)

    x = jax.random.normal(kx, (seq, in_features), jnp.float32).astype(jnp.bfloat16)
    w1 = (0.02 * jax.random.normal(kw1, (in_features, hidden_features),
                                   jnp.float32)).astype(jnp.bfloat16)
    b1 = (0.02 * jax.random.normal(kb1, (hidden_features,),
                                   jnp.float32)).astype(jnp.bfloat16)
    w2 = (0.02 * jax.random.normal(kw2, (hidden_features, in_features),
                                   jnp.float32)).astype(jnp.bfloat16)
    b2 = (0.02 * jax.random.normal(kb2, (in_features,),
                                   jnp.float32)).astype(jnp.bfloat16)

    ref = _reference(x, w1, b1, w2, b2)

    # Auto-selected path (weights VMEM-resident at these sizes, 1-D token grid).
    out = jax.block_until_ready(qwen2_vision_mlp(x, w1, b1, w2, b2))
    assert out.shape == (seq, in_features)
    err = jnp.max(jnp.abs(out.astype(jnp.float32) - ref))
    assert err < 5e-2, f"resident path max abs err {err}"

    # Hidden-streaming fallback (what very large layers / v7x use): 2-D grid
    # with a hidden-reduction axis and f32 accumulator.
    out_s = jax.block_until_ready(
        qwen2_vision_mlp(x, w1, b1, w2, b2, block_tokens=64, block_hidden=128,
                         weight_resident=False))
    err_s = jnp.max(jnp.abs(out_s.astype(jnp.float32) - ref))
    assert err_s < 5e-2, f"streaming path max abs err {err_s}"

    print("KERNEL_OK")
</pallas_src>

<mosaic_0001>
module attributes {stable_mosaic.version = 11 : i64} {
  func.func @_mlp_resident_kernel(%arg0: i32, %arg1: memref<112x128xbf16, #tpu.memory_space<vmem>>, %arg2: memref<128x512xbf16, #tpu.memory_space<vmem>>, %arg3: memref<1x512xbf16, #tpu.memory_space<vmem>>, %arg4: memref<512x128xbf16, #tpu.memory_space<vmem>>, %arg5: memref<1x128xbf16, #tpu.memory_space<vmem>>, %arg6: memref<112x128xbf16, #tpu.memory_space<vmem>>) attributes {dimension_semantics = [#tpu.dimension_semantics<parallel>], iteration_bounds = array<i64: 1>, scalar_prefetch = 0 : i64, scratch_operands = 0 : i64, tpu.core_type = #tpu.core_type<tc>, window_params = [{transform_indices = @transform_0, window_bounds = array<i64: 112, 128>}, {pipeline_mode = #tpu.pipeline_mode<synchronous>, transform_indices = @transform_1, window_bounds = array<i64: 128, 512>}, {pipeline_mode = #tpu.pipeline_mode<synchronous>, transform_indices = @transform_2, window_bounds = array<i64: 1, 512>}, {pipeline_mode = #tpu.pipeline_mode<synchronous>, transform_indices = @transform_3, window_bounds = array<i64: 512, 128>}, {pipeline_mode = #tpu.pipeline_mode<synchronous>, transform_indices = @transform_4, window_bounds = array<i64: 1, 128>}, {transform_indices = @transform_5, window_bounds = array<i64: 112, 128>}]} {
    %c0 = arith.constant 0 : index
    %c0_0 = arith.constant 0 : index
    %0 = vector.load %arg1[%c0, %c0_0] : memref<112x128xbf16, #tpu.memory_space<vmem>>, vector<112x128xbf16>
    %c0_1 = arith.constant 0 : index
    %c0_2 = arith.constant 0 : index
    %1 = vector.load %arg2[%c0_1, %c0_2] : memref<128x512xbf16, #tpu.memory_space<vmem>>, vector<128x512xbf16>
    %cst = arith.constant dense<0.000000e+00> : vector<112x512xf32>
    %2 = tpu.matmul %0, %1, %cst {dimension_numbers = #tpu.dot_dimension_numbers<[1], [0], [0], [1], [0, 0, 1, 1], [], []>} : vector<112x128xbf16>, vector<128x512xbf16>, vector<112x512xf32> -> vector<112x512xf32>
    %c0_3 = arith.constant 0 : index
    %c0_4 = arith.constant 0 : index
    %3 = vector.load %arg3[%c0_3, %c0_4] : memref<1x512xbf16, #tpu.memory_space<vmem>>, vector<1x512xbf16>
    %4 = arith.extf %3 : vector<1x512xbf16> to vector<1x512xf32>
    %5 = vector.broadcast %4 : vector<1x512xf32> to vector<112x512xf32>
    %6 = arith.addf %2, %5 : vector<112x512xf32>
    %cst_5 = arith.constant 1.702000e+00 : f32
    %7 = vector.broadcast %cst_5 : f32 to vector<112x512xf32>
    %8 = arith.mulf %7, %6 : vector<112x512xf32>
    %9 = arith.negf %8 : vector<112x512xf32>
    %10 = math.exp %9 : vector<112x512xf32>
    %cst_6 = arith.constant 1.000000e+00 : f32
    %11 = vector.broadcast %cst_6 : f32 to vector<112x512xf32>
    %12 = arith.addf %11, %10 : vector<112x512xf32>
    %13 = arith.divf %11, %12 : vector<112x512xf32>
    %14 = arith.mulf %6, %13 : vector<112x512xf32>
    %15 = arith.truncf %14 : vector<112x512xf32> to vector<112x512xbf16>
    %c0_7 = arith.constant 0 : index
    %c0_8 = arith.constant 0 : index
    %16 = vector.load %arg4[%c0_7, %c0_8] : memref<512x128xbf16, #tpu.memory_space<vmem>>, vector<512x128xbf16>
    %cst_9 = arith.constant dense<0.000000e+00> : vector<112x128xf32>
    %17 = tpu.matmul %15, %16, %cst_9 {dimension_numbers = #tpu.dot_dimension_numbers<[1], [0], [0], [1], [0, 0, 1, 1], [], []>} : vector<112x512xbf16>, vector<512x128xbf16>, vector<112x128xf32> -> vector<112x128xf32>
    %c0_10 = arith.constant 0 : index
    %c0_11 = arith.constant 0 : index
    %18 = vector.load %arg5[%c0_10, %c0_11] : memref<1x128xbf16, #tpu.memory_space<vmem>>, vector<1x128xbf16>
    %19 = arith.extf %18 : vector<1x128xbf16> to vector<1x128xf32>
    %20 = vector.broadcast %19 : vector<1x128xf32> to vector<112x128xf32>
    %21 = arith.addf %17, %20 : vector<112x128xf32>
    %22 = arith.truncf %21 : vector<112x128xf32> to vector<112x128xbf16>
    %c0_12 = arith.constant 0 : index
    %c0_13 = arith.constant 0 : index
    %23 = vector.load %arg6[%c0_12, %c0_13] : memref<112x128xbf16, #tpu.memory_space<vmem>>, vector<112x128xbf16>
    tpu.vector_store %arg6[%c0_12, %c0_13], %22 {strides = array<i32>} : memref<112x128xbf16, #tpu.memory_space<vmem>>, vector<112x128xbf16>,
    return
  }
  func.func @transform_0(%arg0: i32) -> (i32, i32) {
    %c0_i32 = arith.constant 0 : i32
    %c0_i32_0 = arith.constant 0 : i32
    return %arg0, %c0_i32 : i32, i32
  }
  func.func @transform_1(%arg0: i32) -> (i32, i32) {
    %c0_i32 = arith.constant 0 : i32
    %c0_i32_0 = arith.constant 0 : i32
    %c0_i32_1 = arith.constant 0 : i32
    return %c0_i32, %c0_i32_0 : i32, i32
  }
  func.func @transform_2(%arg0: i32) -> (i32, i32) {
    %c0_i32 = arith.constant 0 : i32
    %c0_i32_0 = arith.constant 0 : i32
    %c0_i32_1 = arith.constant 0 : i32
    return %c0_i32, %c0_i32_0 : i32, i32
  }
  func.func @transform_3(%arg0: i32) -> (i32, i32) {
    %c0_i32 = arith.constant 0 : i32
    %c0_i32_0 = arith.constant 0 : i32
    %c0_i32_1 = arith.constant 0 : i32
    return %c0_i32, %c0_i32_0 : i32, i32
  }
  func.func @transform_4(%arg0: i32) -> (i32, i32) {
    %c0_i32 = arith.constant 0 : i32
    %c0_i32_0 = arith.constant 0 : i32
    %c0_i32_1 = arith.constant 0 : i32
    return %c0_i32, %c0_i32_0 : i32, i32
  }
  func.func @transform_5(%arg0: i32) -> (i32, i32) {
    %c0_i32 = arith.constant 0 : i32
    %c0_i32_0 = arith.constant 0 : i32
    return %arg0, %c0_i32 : i32, i32
  }
}

</mosaic_0001>

<bundles_post_ra>
// kernel: tpu_custom_call.1
= control target key start
LH: loop header
LB: loop body
LE: loop exit
PB: predicated region body
PF: predicated region fallthrough
CT: control target
= control target key end

     0   :  { %10 = vsyncpa [#allocation3], 0  ;;  %s2827_s0 = inlined_call_operand.hbm [shape: bf16[112,128], index: 0, kind: input, shape index: {}]   ;;  %s2828_s1 = inlined_call_operand.hbm [shape: bf16[128,512], index: 1, kind: input, shape index: {}]   ;;  %s2829_s2 = inlined_call_operand.hbm [shape: bf16[1,512], index: 2, kind: input, shape index: {}]   ;;  %s2830_s3 = inlined_call_operand.hbm [shape: bf16[512,128], index: 3, kind: input, shape index: {}]   ;;  %s2831_s4 = inlined_call_operand.vmem [shape: bf16[1,128], index: 4, kind: input, shape index: {}]   ;;  %s2832_s5 = inlined_call_operand.hbm [shape: bf16[112,128], index: 5, kind: output, shape index: {}]  }
   0x1   :  { %11 = vsyncpa [#allocation6], 0 }
   0x2   :  { %12 = vsyncpa [#allocation9], 0 }
   0x3   :  { %13 = vsyncpa [#allocation4], 0  ;;  %s2314_s18 = smov [#allocation5]  }
   0x4   :  { %s31_s19 = sshll.u32 %s2314_s18, 4  ;;  %s32_s19 = int_to_ptr.vmem [resolvable:$true] %s31_s19 }
   0x5   :  { %s2214_s20 = scalar_lea.vmem %s32_s19, 4096  ;;  %p2219_p1 = scmp.lt.s32.totalorder %s32_s19, %s32_s19 }
   0x6   :  { %p2215_p0 = scmp.ne.s32.totalorder %s32_s19, %s2214_s20  ;;  %p2220_p2 = scmp.lt.s32.totalorder %s2214_s20, %s2214_s20 }
   0x8   :  { %p2221_p3 = por %p2220_p2, %p2219_p1 }
   0xa   :  { %p2222_p4 = pnand %p2221_p3, %p2215_p0 }
   0xc   :  { %2225 = shalt.err (!%p2222_p4)
}
   0xd   :  { %s2315_s21 = smov 256   ;;  %s2316_s22 = smov 16  }
   0xe   :  { %37 = dma.hbm_to_vmem [thread:$0]  %s2828_s1, 4096, %s32_s19, [#allocation6], %s2315_s21, %s2315_s21, %s2316_s22  }
   0xf   :  { %s2317_s25 = smov [#allocation2]  }
  0x10   :  { %s19_s26 = sshll.u32 %s2317_s25, 4  ;;  %s20_s26 = int_to_ptr.vmem [resolvable:$true] %s19_s26 }
  0x11   :  { %s2234_s27 = scalar_lea.vmem %s20_s26, 896  ;;  %p2239_p6 = scmp.lt.s32.totalorder %s20_s26, %s20_s26 }
  0x12   :  { %p2235_p5 = scmp.ne.s32.totalorder %s20_s26, %s2234_s27  ;;  %p2240_p7 = scmp.lt.s32.totalorder %s2234_s27, %s2234_s27 }
  0x14   :  { %p2241_p8 = por %p2240_p7, %p2239_p6 }
  0x16   :  { %p2242_p9 = pnand %p2241_p8, %p2235_p5 }
  0x18   :  { %2245 = shalt.err (!%p2242_p9)
}
  0x19   :  { %s2318_s28 = smov 64   ;;  %s2319_s29 = smov 4  }
  0x1a   :  { %25 = dma.hbm_to_vmem [thread:$0]  %s2827_s0, 896, %s20_s26, [#allocation3], %s2318_s28, %s2318_s28, %s2319_s29  }
  0x1b   :  { %s2320_s1 = smov [#allocation7]   ;;  %s2321_s8 = smov [#allocation8]  }
  0x1c   :  { %s44_s7 = sshll.u32 %s2320_s1, 4  ;;  %s53_s9 = sshll.u32 %s2321_s8, 4  ;;  %s45_s7 = int_to_ptr.vmem [resolvable:$true] %s44_s7  ;;  %s54_s9 = int_to_ptr.vmem [resolvable:$true] %s53_s9 }
  0x1d   :  { %s2254_s10 = scalar_lea.vmem %s45_s7, 64  ;;  %p2259_p11 = scmp.lt.s32.totalorder %s45_s7, %s45_s7 }
  0x1e   :  { %p2255_p10 = scmp.ne.s32.totalorder %s45_s7, %s2254_s10  ;;  %p2260_p12 = scmp.lt.s32.totalorder %s2254_s10, %s2254_s10 }
  0x20   :  { %p2261_p13 = por %p2260_p12, %p2259_p11 }
  0x22   :  { %p2262_p0 = pnand %p2261_p13, %p2255_p10 }
  0x24   :  { %2265 = shalt.err (!%p2262_p0)
}
  0x25   :  { %47 = dma.hbm_to_vmem [thread:$0]  %s2829_s2, 64, %s45_s7, [#allocation6]  }
  0x26   :  { %s2274_s13 = scalar_lea.vmem %s54_s9, 4096  ;;  %p2279_p2 = scmp.lt.s32.totalorder %s54_s9, %s54_s9 }
  0x27   :  { %p2275_p1 = scmp.ne.s32.totalorder %s54_s9, %s2274_s13  ;;  %p2280_p3 = scmp.lt.s32.totalorder %s2274_s13, %s2274_s13 }
  0x29   :  { %p2281_p4 = por %p2280_p3, %p2279_p2 }
  0x2b   :  { %p2282_p5 = pnand %p2281_p4, %p2275_p1 }
  0x2d   :  { %2285 = shalt.err (!%p2282_p5)
}
  0x2e   :  { %59 = dma.hbm_to_vmem [thread:$0]  %s2830_s3, 4096, %s54_s9, [#allocation9], %s2318_s28, %s2318_s28, %s2319_s29  }
  0x2f   :  { %2306 = dma.done.wait [#allocation3], 896  }
  0x30   :  { %2307 = vsyncadd [#allocation3], 4294966400 }
  0x31   :  { %2308 = dma.done.wait [#allocation6], 4160  }
  0x32   :  { %2309 = vsyncadd [#allocation6], 4294963136 }
  0x33   :  { %2310 = dma.done.wait [#allocation9], 4096  }
  0x34   :  { %2311 = vsyncadd [#allocation9], 4294963200  ;;  %v2322_v0 = vmov 0   ;;  %v1895_v1 = vld [vmem:[#allocation5 + $0xe4] ss:$16 sps:$4 sm:$0xff]   ;;  %v1950_v33 = vld [vmem:[#allocation8 + $0x78] sm:$0xff]  }
  0x35   :  { %394 = vmatprep.mubr.bf16.mxu0 %v2322_v0  ;;  %497 = vmatprep.mubr.bf16.mxu1 %v2322_v0  ;;  %v1897_v2 = vld [vmem:[#allocation5 + $0xec] ss:$16 sps:$4 sm:$0xff]   ;;  %v1899_v3 = vld [vmem:[#allocation5 + $0xe0] ss:$16 sps:$4 sm:$0xff]   ;;  %v1900_v4 = vld [vmem:[#allocation5 + $0xe8] ss:$16 sps:$4 sm:$0xff]  }
  0x36   :  { %362 = vmatprep.subr.bf16.mxu0 %v1895_v1  ;;  %465 = vmatprep.subr.bf16.mxu1 %v1897_v2  ;;  %v1901_v5 = vld [vmem:[#allocation5 + $0xc4] ss:$16 sps:$4 sm:$0xff]   ;;  %v1903_v6 = vld [vmem:[#allocation5 + $0xcc] ss:$16 sps:$4 sm:$0xff]   ;;  %v1905_v7 = vld [vmem:[#allocation5 + $0xc0] ss:$16 sps:$4 sm:$0xff]  }
  0x37   :  { %363 = vmatpush1.bf16.msra.mxu0 %v1899_v3  ;;  %466 = vmatpush1.bf16.msra.mxu1 %v1900_v4  ;;  %v1906_v8 = vld [vmem:[#allocation5 + $0xc8] ss:$16 sps:$4 sm:$0xff]   ;;  %v1907_v9 = vld [vmem:[#allocation5 + $0xa4] ss:$16 sps:$4 sm:$0xff]   ;;  %v1909_v10 = vld [vmem:[#allocation5 + $0xac] ss:$16 sps:$4 sm:$0xff]  }
  0x38   :  { %364 = vmatprep.subr.bf16.mxu0 %v1901_v5  ;;  %467 = vmatprep.subr.bf16.mxu1 %v1903_v6  ;;  %v1911_v11 = vld [vmem:[#allocation5 + $0xa0] ss:$16 sps:$4 sm:$0xff]   ;;  %v1912_v12 = vld [vmem:[#allocation5 + $0xa8] ss:$16 sps:$4 sm:$0xff]   ;;  %v1913_v13 = vld [vmem:[#allocation5 + $0x84] ss:$16 sps:$4 sm:$0xff]  }
  0x39   :  { %v1915_v14 = vld [vmem:[#allocation5 + $0x8c] ss:$16 sps:$4 sm:$0xff]   ;;  %v1917_v15 = vld [vmem:[#allocation5 + $0x80] ss:$16 sps:$4 sm:$0xff]   ;;  %v1918_v16 = vld [vmem:[#allocation5 + $0x88] ss:$16 sps:$4 sm:$0xff]  }
  0x3a   :  { %v1919_v17 = vld [vmem:[#allocation5 + $0x64] ss:$16 sps:$4 sm:$0xff]   ;;  %v1921_v18 = vld [vmem:[#allocation5 + $0x6c] ss:$16 sps:$4 sm:$0xff]   ;;  %v1923_v19 = vld [vmem:[#allocation5 + $0x60] ss:$16 sps:$4 sm:$0xff]  }
  0x3b   :  { %365 = vmatpush1.bf16.msra.mxu0 %v1905_v7  ;;  %468 = vmatpush1.bf16.msra.mxu1 %v1906_v8  ;;  %v1924_v20 = vld [vmem:[#allocation5 + $0x68] ss:$16 sps:$4 sm:$0xff]   ;;  %v1925_v21 = vld [vmem:[#allocation5 + $0x44] ss:$16 sps:$4 sm:$0xff]   ;;  %v1927_v22 = vld [vmem:[#allocation5 + $0x4c] ss:$16 sps:$4 sm:$0xff]   ;;  %v124_v8 = vlaneseq }
  0x3c   :  { %366 = vmatprep.subr.bf16.mxu0 %v1907_v9  ;;  %469 = vmatprep.subr.bf16.mxu1 %v1909_v10  ;;  %v1929_v23 = vld [vmem:[#allocation5 + $0x40] ss:$16 sps:$4 sm:$0xff]   ;;  %v1930_v24 = vld [vmem:[#allocation5 + $0x48] ss:$16 sps:$4 sm:$0xff]   ;;  %v1931_v25 = vld [vmem:[#allocation5 + $0x24] ss:$16 sps:$4 sm:$0xff]  }
  0x3d   :  { %v1933_v26 = vld [vmem:[#allocation5 + $0x2c] ss:$16 sps:$4 sm:$0xff]   ;;  %v1935_v27 = vld [vmem:[#allocation5 + $0x20] ss:$16 sps:$4 sm:$0xff]   ;;  %v1936_v28 = vld [vmem:[#allocation5 + $0x28] ss:$16 sps:$4 sm:$0xff]  }
  0x3e   :  { %v1937_v29 = vld [vmem:[#allocation5 + $0x4] ss:$16 sps:$4 sm:$0xff]   ;;  %v1939_v30 = vld [vmem:[#allocation5 + $0xc] ss:$16 sps:$4 sm:$0xff]   ;;  %v1941_v31 = vld [vmem:[#allocation5] ss:$16 sps:$4 sm:$0xff]  }
  0x3f   :  { %367 = vmatpush1.bf16.msra.mxu0 %v1911_v11  ;;  %470 = vmatpush1.bf16.msra.mxu1 %v1912_v12  ;;  %v1942_v32 = vld [vmem:[#allocation5 + $0x8] ss:$16 sps:$4 sm:$0xff]   ;;  %v1952_v35 = vld [vmem:[#allocation8 + $0xf8] sm:$0xff]   ;;  %v1944_v40 = vld [vmem:[#allocation2 + $0x8] sm:$0xff]   ;;  %v125_v9 = vshrl.u32 %v124_v8, 7 }
  0x40   :  { %368 = vmatprep.subr.bf16.mxu0 %v1913_v13  ;;  %471 = vmatprep.subr.bf16.mxu1 %v1915_v14  ;;  %v1943_v34 = vld [vmem:[#allocation2] sm:$0xff]   ;;  %v1951_v36 = vld [vmem:[#allocation8 + $0x38] sm:$0xff]   ;;  %v1954_v38 = vld [vmem:[#allocation8 + $0x70] sm:$0xff]  }
  0x41   :  { %v1953_v37 = vld [vmem:[#allocation8 + $0xb8] sm:$0xff]   ;;  %v1955_v39 = vld [vmem:[#allocation8 + $0x30] sm:$0xff]   ;;  %v1947_v43 = vld [vmem:[#allocation2 + $0x20] sm:$0xff]   ;;  %v2386_v12 = vsub.s32 0, %v125_v9  ;;  %v134_v13 = vsub.s32 4, %v125_v9  ;;  %v130_v14 = vsub.s32 2, %v125_v9 }
  0x42   :  { %v1945_v41 = vld [vmem:[#allocation2 + $0x10] sm:$0xff]   ;;  %v1946_v42 = vld [vmem:[#allocation2 + $0x18] sm:$0xff]   ;;  %v1948_v44 = vld [vmem:[#allocation2 + $0x28] sm:$0xff]  }
  0x43   :  { %369 = vmatpush1.bf16.msra.mxu0 %v1917_v15  ;;  %472 = vmatpush1.bf16.msra.mxu1 %v1918_v16  ;;  %v1949_v45 = vld [vmem:[#allocation2 + $0x30] sm:$0xff]   ;;  %v1958_v48 = vld [vmem:[#allocation8 + $0x68] sm:$0xff]   ;;  %v1962_v52 = vld [vmem:[#allocation8 + $0x60] sm:$0xff]   ;;  %2844 = vst [vmem:[#allocation15_spill] sm:$0xff] %v2386_v12  ;;  %v138_v15 = vsub.s32 6, %v125_v9 }
  0x44   :  { %370 = vmatprep.subr.bf16.mxu0 %v1919_v17  ;;  %473 = vmatprep.subr.bf16.mxu1 %v1921_v18  ;;  %v1956_v46 = vld [vmem:[#allocation8 + $0xf0] sm:$0xff]   ;;  %v1960_v49 = vld [vmem:[#allocation8 + $0xe8] sm:$0xff]   ;;  %v1964_v53 = vld [vmem:[#allocation8 + $0xe0] sm:$0xff]  }
  0x45   :  { %v1957_v47 = vld [vmem:[#allocation8 + $0xb0] sm:$0xff]   ;;  %v1959_v50 = vld [vmem:[#allocation8 + $0x28] sm:$0xff]   ;;  %v1963_v54 = vld [vmem:[#allocation8 + $0x20] sm:$0xff]  }
  0x46   :  { %v1961_v51 = vld [vmem:[#allocation8 + $0xa8] sm:$0xff]   ;;  %v1965_v55 = vld [vmem:[#allocation8 + $0xa0] sm:$0xff]   ;;  %v1966_v56 = vld [vmem:[#allocation8 + $0x58] sm:$0xff]  }
  0x47   :  { %371 = vmatpush1.bf16.msra.mxu0 %v1923_v19  ;;  %474 = vmatpush1.bf16.msra.mxu1 %v1924_v20  ;;  %v1968_v57 = vld [vmem:[#allocation8 + $0xd8] sm:$0xff]   ;;  %v1970_v60 = vld [vmem:[#allocation8 + $0x50] sm:$0xff]   ;;  %v1976_v1 = vld [vmem:[#allocation8 + $0xc8] sm:$0xff]  }
  0x48   :  { %372 = vmatprep.subr.bf16.mxu0 %v1925_v21  ;;  %475 = vmatprep.subr.bf16.mxu1 %v1927_v22  ;;  %v1967_v58 = vld [vmem:[#allocation8 + $0x18] sm:$0xff]   ;;  %v1972_v61 = vld [vmem:[#allocation8 + $0xd0] sm:$0xff]   ;;  %v1975_v2 = vld [vmem:[#allocation8 + $0x8] sm:$0xff]  }
  0x49   :  { %v1969_v59 = vld [vmem:[#allocation8 + $0x98] sm:$0xff]   ;;  %v1971_v62 = vld [vmem:[#allocation8 + $0x10] sm:$0xff]   ;;  %v1977_v3 = vld [vmem:[#allocation8 + $0x88] sm:$0xff]  }
  0x4a   :  { %v1973_v63 = vld [vmem:[#allocation8 + $0x90] sm:$0xff]   ;;  %v1978_v4 = vld [vmem:[#allocation8 + $0x40] sm:$0xff]   ;;  %v121_v10 = vld [vmem:[#allocation7] sm:$0xf] }
  0x4b   :  { %373 = vmatpush1.bf16.msra.mxu0 %v1929_v23  ;;  %476 = vmatpush1.bf16.msra.mxu1 %v1930_v24  ;;  %v1980_v5 = vld [vmem:[#allocation8 + $0xc0] sm:$0xff]   ;;  %v122_v11 = vunpack.c.l.bf16 %v121_v10 }
  0x4c   :  { %374 = vmatprep.subr.bf16.mxu0 %v1931_v25  ;;  %477 = vmatprep.subr.bf16.mxu1 %v1933_v26  ;;  %v1979_v6 = vld [vmem:[#allocation8] sm:$0xff]  }
  0x4d   :  { %v1981_v7 = vld [vmem:[#allocation8 + $0x80] sm:$0xff]   ;;  %v127_v16 = vrot.slane %v122_v11, %v2386_v12  ;;  %v135_v17 = vrot.slane %v122_v11, %v134_v13  ;;  %v131_v18 = vrot.slane %v122_v11, %v130_v14  ;;  %v139_v19 = vrot.slane %v122_v11, %v138_v15 }
  0x4f   :  { %375 = vmatpush1.bf16.msra.mxu0 %v1935_v27  ;;  %478 = vmatpush1.bf16.msra.mxu1 %v1936_v28  ;;  %v2390_v20 = vrot.slane %v127_v16, %v2386_v12  ;;  %v2393_v21 = vrot.slane %v135_v17, %v2386_v12  ;;  %v2396_v22 = vrot.slane %v131_v18, %v2386_v12 }
  0x50   :  { %376 = vmatprep.subr.bf16.mxu0 %v1937_v29  ;;  %479 = vmatprep.subr.bf16.mxu1 %v1939_v30  ;;  %v2399_v23 = vrot.slane %v139_v19, %v2386_v12 }
  0x53   :  { %377 = vmatpush1.bf16.msra.mxu0 %v1941_v31  ;;  %480 = vmatpush1.bf16.msra.mxu1 %v1942_v32 }
  0x54   :  { %1769 = vmatprep.subr.bf16.mxu0 %v1950_v33  ;;  %1827 = vmatprep.subr.bf16.mxu1 %v1952_v35 }
  0x56   :  { %395 = vmatmul.mubr.bf16.vlgmr.msra.gmra.mxu0 %v1943_v34  ;;  %498 = vmatmul.mubr.bf16.vlgmr.msra.gmra.mxu1 %v1943_v34 }
  0x57   :  { %404 = vmatprep.mubr.bf16.mxu0 %v2322_v0  ;;  %507 = vmatprep.mubr.bf16.mxu1 %v2322_v0 }
  0x58   :  { %1770 = vmatpush3.bf16.msra.mxu0 %v1951_v36  ;;  %1828 = vmatpush3.bf16.msra.mxu1 %v1953_v37 }
  0x59   :  { %1771 = vmatprep.subr.bf16.mxu0 %v1954_v38  ;;  %1829 = vmatprep.subr.bf16.mxu1 %v1956_v46 }
  0x5c   :  { %1772 = vmatpush3.bf16.msra.mxu0 %v1955_v39  ;;  %1830 = vmatpush3.bf16.msra.mxu1 %v1957_v47 }
  0x5d   :  { %1773 = vmatprep.subr.bf16.mxu0 %v1958_v48  ;;  %1831 = vmatprep.subr.bf16.mxu1 %v1960_v49 }
  0x5e   :  { %405 = vmatmul.mubr.bf16.gmra.mxu0 %v1944_v40  ;;  %508 = vmatmul.mubr.bf16.gmra.mxu1 %v1944_v40 }
  0x5f   :  { %414 = vmatprep.mubr.bf16.mxu0 %v2322_v0  ;;  %517 = vmatprep.mubr.bf16.mxu1 %v2322_v0 }
  0x60   :  { %1774 = vmatpush3.bf16.msra.mxu0 %v1959_v50  ;;  %1832 = vmatpush3.bf16.msra.mxu1 %v1961_v51 }
  0x61   :  { %1775 = vmatprep.subr.bf16.mxu0 %v1962_v52  ;;  %1833 = vmatprep.subr.bf16.mxu1 %v1964_v53 }
  0x64   :  { %1776 = vmatpush3.bf16.msra.mxu0 %v1963_v54  ;;  %1834 = vmatpush3.bf16.msra.mxu1 %v1965_v55 }
  0x65   :  { %1777 = vmatprep.subr.bf16.mxu0 %v1966_v56  ;;  %1835 = vmatprep.subr.bf16.mxu1 %v1968_v57 }
  0x66   :  { %415 = vmatmul.mubr.bf16.gmra.mxu0 %v1945_v41  ;;  %518 = vmatmul.mubr.bf16.gmra.mxu1 %v1945_v41 }
  0x67   :  { %424 = vmatprep.mubr.bf16.mxu0 %v2322_v0  ;;  %527 = vmatprep.mubr.bf16.mxu1 %v2322_v0 }
  0x68   :  { %1778 = vmatpush3.bf16.msra.mxu0 %v1967_v58  ;;  %1836 = vmatpush3.bf16.msra.mxu1 %v1969_v59 }
  0x69   :  { %1779 = vmatprep.subr.bf16.mxu0 %v1970_v60  ;;  %1837 = vmatprep.subr.bf16.mxu1 %v1972_v61 }
  0x6c   :  { %1780 = vmatpush3.bf16.msra.mxu0 %v1971_v62  ;;  %1838 = vmatpush3.bf16.msra.mxu1 %v1973_v63 }
  0x6d   :  { %1839 = vmatprep.subr.bf16.mxu1 %v1976_v1 }
  0x6e   :  { %425 = vmatmul.mubr.bf16.gmra.mxu0 %v1946_v42  ;;  %528 = vmatmul.mubr.bf16.gmra.mxu1 %v1946_v42 }
  0x6f   :  { %434 = vmatprep.mubr.bf16.mxu0 %v2322_v0  ;;  %537 = vmatprep.mubr.bf16.mxu1 %v2322_v0 }
  0x70   :  { %1840 = vmatpush3.bf16.msra.mxu1 %v1977_v3 }
  0x71   :  { %1841 = vmatprep.subr.bf16.mxu1 %v1980_v5 }
  0x74   :  { %1842 = vmatpush3.bf16.msra.mxu1 %v1981_v7 }
  0x76   :  { %435 = vmatmul.mubr.bf16.gmra.mxu0 %v1947_v43  ;;  %538 = vmatmul.mubr.bf16.gmra.mxu1 %v1947_v43 }
  0x77   :  { %444 = vmatprep.mubr.bf16.mxu0 %v2322_v0  ;;  %547 = vmatprep.mubr.bf16.mxu1 %v2322_v0 }
  0x7e   :  { %445 = vmatmul.mubr.bf16.gmra.mxu0 %v1948_v44  ;;  %548 = vmatmul.mubr.bf16.gmra.mxu1 %v1948_v44 }
  0x7f   :  { %454 = vmatprep.mubr.bf16.mxu0 %v2322_v0  ;;  %557 = vmatprep.mubr.bf16.mxu1 %v2322_v0  ;;  %v1974_v0 = vld [vmem:[#allocation8 + $0x48] sm:$0xff]  }
  0x80   :  { %1781 = vmatprep.subr.bf16.mxu0 %v1974_v0 }
  0x81   :  { %1782 = vmatpush3.bf16.msra.mxu0 %v1975_v2 }
  0x82   :  { %1783 = vmatprep.subr.bf16.mxu0 %v1978_v4 }
  0x85   :  { %1784 = vmatpush3.bf16.msra.mxu0 %v1979_v6 }
  0x86   :  { %455 = vmatmul.mubr.bf16.gmra.mxu0 %v1949_v45  ;;  %558 = vmatmul.mubr.bf16.gmra.mxu1 %v1949_v45 }
 0x116   :  { %v396_v24 = vpop.f32.mrf.mxu0  ;;  %v499_v25 = vpop.f32.mrf.mxu1 }
 0x117   :  { %v2402_v26 = vadd.f32 %v396_v24, %v2390_v20  ;;  %v2405_v27 = vadd.f32 %v499_v25, %v2393_v21 }
 0x118   :  { %v398_v28 = vpop.f32.mrf.mxu0  ;;  %v501_v29 = vpop.f32.mrf.mxu1 }
 0x119   :  { %v1612_v30 = vmul.f32 -1.702, %v2402_v26  ;;  %v1614_v31 = vmul.f32 -1.702, %v2405_v27  ;;  %v2410_v32 = vadd.f32 %v398_v28, %v2396_v22  ;;  %v2413_v33 = vadd.f32 %v501_v29, %v2399_v23 }
 0x11a   :  { %v400_v34 = vpop.f32.mrf.mxu0  ;;  %v503_v35 = vpop.f32.mrf.mxu1 }
 0x11b   :  { %v680_v36 = vmul.f32 1.442695, %v1612_v30  ;;  %v684_v37 = vmul.f32 1.442695, %v1614_v31  ;;  %v1613_v38 = vmul.f32 -1.702, %v2410_v32  ;;  %v2417_v39 = vadd.f32 %v400_v34, %v2390_v20 }
 0x11c   :  { %v1615_v40 = vmul.f32 -1.702, %v2413_v33  ;;  %v2421_v41 = vadd.f32 %v503_v35, %v2393_v21  ;;  %v402_v42 = vpop.f32.mrf.mxu0  ;;  %v505_v43 = vpop.f32.mrf.mxu1 }
 0x11d   :  { %1982 = vpow2.f32 %v680_v36  ;;  %v682_v44 = vmul.f32 1.442695, %v1613_v38  ;;  %v1616_v45 = vmul.f32 -1.702, %v2417_v39  ;;  %v2425_v46 = vadd.f32 %v402_v42, %v2396_v22 }
 0x11e   :  { %1984 = vpow2.f32 %v684_v37  ;;  %v686_v47 = vmul.f32 1.442695, %v1615_v40  ;;  %v1618_v48 = vmul.f32 -1.702, %v2421_v41  ;;  %v2429_v49 = vadd.f32 %v505_v43, %v2399_v23  ;;  %v406_v50 = vpop.f32.mrf.mxu0  ;;  %v509_v51 = vpop.f32.mrf.mxu1 }
 0x11f   :  { %1986 = vpow2.f32 %v682_v44  ;;  %v688_v52 = vmul.f32 1.442695, %v1616_v45  ;;  %v1617_v53 = vmul.f32 -1.702, %v2425_v46  ;;  %v2433_v54 = vadd.f32 %v406_v50, %v2390_v20 }
 0x120   :  { %1988 = vpow2.f32 %v686_v47  ;;  %v692_v55 = vmul.f32 1.442695, %v1618_v48  ;;  %v1619_v56 = vmul.f32 -1.702, %v2429_v49  ;;  %v2437_v57 = vadd.f32 %v509_v51, %v2393_v21  ;;  %v408_v58 = vpop.f32.mrf.mxu0  ;;  %v511_v59 = vpop.f32.mrf.mxu1 }
 0x121   :  { %1990 = vpow2.f32 %v688_v52  ;;  %v690_v60 = vmul.f32 1.442695, %v1617_v53  ;;  %v1620_v61 = vmul.f32 -1.702, %v2433_v54  ;;  %v2441_v62 = vadd.f32 %v408_v58, %v2396_v22 }
 0x122   :  { %1992 = vpow2.f32 %v692_v55  ;;  %v694_v63 = vmul.f32 1.442695, %v1619_v56  ;;  %v1622_v0 = vmul.f32 -1.702, %v2437_v57  ;;  %v2445_v1 = vadd.f32 %v511_v59, %v2399_v23  ;;  %v410_v2 = vpop.f32.mrf.mxu0  ;;  %v513_v3 = vpop.f32.mrf.mxu1 }
 0x123   :  { %1994 = vpow2.f32 %v690_v60  ;;  %v696_v4 = vmul.f32 1.442695, %v1620_v61  ;;  %v1621_v5 = vmul.f32 -1.702, %v2441_v62  ;;  %v2449_v6 = vadd.f32 %v410_v2, %v2390_v20 }
 0x124   :  { %1996 = vpow2.f32 %v694_v63  ;;  %v700_v7 = vmul.f32 1.442695, %v1622_v0  ;;  %v1623_v8 = vmul.f32 -1.702, %v2445_v1  ;;  %v2453_v9 = vadd.f32 %v513_v3, %v2393_v21  ;;  %v412_v10 = vpop.f32.mrf.mxu0  ;;  %v515_v11 = vpop.f32.mrf.mxu1 }
 0x125   :  { %1998 = vpow2.f32 %v696_v4  ;;  %v698_v13 = vmul.f32 1.442695, %v1621_v5  ;;  %v1624_v14 = vmul.f32 -1.702, %v2449_v6  ;;  %v2457_v15 = vadd.f32 %v412_v10, %v2396_v22 }
 0x126   :  { %2000 = vpow2.f32 %v700_v7  ;;  %v702_v16 = vmul.f32 1.442695, %v1623_v8  ;;  %v1626_v17 = vmul.f32 -1.702, %v2453_v9  ;;  %v2461_v18 = vadd.f32 %v515_v11, %v2399_v23  ;;  %v416_v19 = vpop.f32.mrf.mxu0  ;;  %v519_v24 = vpop.f32.mrf.mxu1 }
 0x127   :  { %2002 = vpow2.f32 %v698_v13  ;;  %v704_v25 = vmul.f32 1.442695, %v1624_v14  ;;  %v1625_v28 = vmul.f32 -1.702, %v2457_v15  ;;  %v2466_v51 = vadd.f32 %v416_v19, %v2390_v20 }
 0x128   :  { %2004 = vpow2.f32 %v702_v16  ;;  %v708_v29 = vmul.f32 1.442695, %v1626_v17  ;;  %v1627_v30 = vmul.f32 -1.702, %v2461_v18  ;;  %v418_v31 = vpop.f32.mrf.mxu0  ;;  %v521_v34 = vpop.f32.mrf.mxu1  ;;  %v2469_v59 = vadd.f32 %v519_v24, %v2393_v21 }
 0x129   :  { %2006 = vpow2.f32 %v704_v25  ;;  %v706_v35 = vmul.f32 1.442695, %v1625_v28  ;;  %2845 = vst [vmem:[#allocation16_spill] sm:$0xff] %v2466_v51  ;;  %v1628_v3 = vmul.f32 -1.702, %v2466_v51  ;;  %v2473_v8 = vadd.f32 %v418_v31, %v2396_v22 }
 0x12a   :  { %v1983_v36 = vpop.eup %1982  ;;  %2008 = vpow2.f32 %v708_v29  ;;  %v710_v37 = vmul.f32 1.442695, %v1627_v30  ;;  %v420_v38 = vpop.f32.mrf.mxu0  ;;  %2846 = vst [vmem:[#allocation17_spill] sm:$0xff] %v2469_v59  ;;  %v1630_v13 = vmul.f32 -1.702, %v2469_v59  ;;  %v2477_v17 = vadd.f32 %v521_v34, %v2399_v23 }
 0x12b   :  { %v523_v40 = vpop.f32.mrf.mxu1  ;;  %v1985_v42 = vpop.eup %1984  ;;  %v792_v43 = vadd.f32 1.0, %v1983_v36  ;;  %2010 = vpow2.f32 %v706_v35  ;;  %v712_v28 = vmul.f32 1.442695, %v1628_v3  ;;  %v2480_v29 = vadd.f32 %v420_v38, %v2390_v20 }
 0x12c   :  { %v1987_v44 = vpop.eup %1986  ;;  %v794_v45 = vadd.f32 1.0, %v1985_v42  ;;  %2012 = vpow2.f32 %v710_v37  ;;  %v422_v47 = vpop.f32.mrf.mxu0  ;;  %v1629_v36 = vmul.f32 -1.702, %v2473_v8  ;;  %v2484_v37 = vadd.f32 %v523_v40, %v2393_v21 }
 0x12d   :  { %v1989_v48 = vpop.eup %1988  ;;  %2014 = vrcp.f32 %v792_v43  ;;  %v793_v50 = vadd.f32 1.0, %v1987_v44  ;;  %v525_v52 = vpop.f32.mrf.mxu1  ;;  %v716_v43 = vmul.f32 1.442695, %v1630_v13  ;;  %v2487_v44 = vadd.f32 %v422_v47, %v2396_v22 }
 0x12e   :  { %v1991_v53 = vpop.eup %1990  ;;  %2016 = vrcp.f32 %v794_v45  ;;  %v795_v55 = vadd.f32 1.0, %v1989_v48  ;;  %v426_v63 = vpop.f32.mrf.mxu0  ;;  %v1631_v48 = vmul.f32 -1.702, %v2477_v17  ;;  %v714_v3 = vmul.f32 1.442695, %v1629_v36 }
 0x12f   :  { %v1993_v56 = vpop.eup %1992  ;;  %2018 = vrcp.f32 %v793_v50  ;;  %v796_v58 = vadd.f32 1.0, %v1991_v53  ;;  %v529_v4 = vpop.f32.mrf.mxu1  ;;  %v2491_v50 = vadd.f32 %v525_v52, %v2399_v23 }
 0x130   :  { %v1995_v60 = vpop.eup %1994  ;;  %2020 = vrcp.f32 %v795_v55  ;;  %v798_v61 = vadd.f32 1.0, %v1993_v56  ;;  %v428_v19 = vpop.f32.mrf.mxu0  ;;  %v1632_v56 = vmul.f32 -1.702, %v2480_v29 }
 0x131   :  { %v1997_v0 = vpop.eup %1996  ;;  %2022 = vrcp.f32 %v796_v58  ;;  %v797_v2 = vadd.f32 1.0, %v1995_v60  ;;  %v531_v30 = vpop.f32.mrf.mxu1  ;;  %v2495_v58 = vadd.f32 %v426_v63, %v2390_v20 }
 0x132   :  { %v1999_v5 = vpop.eup %1998  ;;  %2024 = vrcp.f32 %v798_v61  ;;  %v799_v7 = vadd.f32 1.0, %v1997_v0  ;;  %v430_v53 = vpop.f32.mrf.mxu0  ;;  %v1634_v0 = vmul.f32 -1.702, %v2484_v37  ;;  %v2513_v13 = vadd.f32 %v531_v30, %v2399_v23 }
 0x133   :  { %v2001_v10 = vpop.eup %2000  ;;  %2026 = vrcp.f32 %v797_v2  ;;  %v800_v11 = vadd.f32 1.0, %v1999_v5  ;;  %2847 = vst [vmem:[#allocation18_spill] sm:$0xff] %v2495_v58  ;;  %v533_v60 = vpop.f32.mrf.mxu1  ;;  %v2501_v2 = vadd.f32 %v529_v4, %v2393_v21  ;;  %v1633_v5 = vmul.f32 -1.702, %v2487_v44 }
 0x134   :  { %v2003_v14 = vpop.eup %2002  ;;  %2028 = vrcp.f32 %v799_v7  ;;  %v802_v16 = vadd.f32 1.0, %v2001_v10  ;;  %v2507_v7 = vadd.f32 %v428_v19, %v2396_v22  ;;  %v718_v10 = vmul.f32 1.442695, %v1631_v48  ;;  %v432_v4 = vpop.f32.mrf.mxu0 }
 0x135   :  { %v2005_v24 = vpop.eup %2004  ;;  %2030 = vrcp.f32 %v800_v11  ;;  %v801_v25 = vadd.f32 1.0, %v2003_v14  ;;  %2848 = vst [vmem:[#allocation19_spill] sm:$0xff] %v2501_v2  ;;  %v1635_v11 = vmul.f32 -1.702, %v2491_v50  ;;  %v535_v19 = vpop.f32.mrf.mxu1  ;;  %v1638_v36 = vmul.f32 -1.702, %v2501_v2 }
 0x136   :  { %v2007_v31 = vpop.eup %2006  ;;  %2032 = vrcp.f32 %v802_v16  ;;  %v803_v35 = vadd.f32 1.0, %v2005_v24  ;;  %v720_v16 = vmul.f32 1.442695, %v1632_v56  ;;  %v1636_v24 = vmul.f32 -1.702, %v2495_v58 }
 0x137   :  { %v2009_v42 = vpop.eup %2008  ;;  %2034 = vrcp.f32 %v801_v25  ;;  %v804_v34 = vadd.f32 1.0, %v2007_v31  ;;  %v2519_v25 = vadd.f32 %v430_v53, %v2390_v20  ;;  %v726_v48 = vmul.f32 1.442695, %v1635_v11 }
 0x138   :  { %v2011_v45 = vpop.eup %2010  ;;  %2036 = vrcp.f32 %v803_v35  ;;  %v806_v38 = vadd.f32 1.0, %v2009_v42  ;;  %v724_v35 = vmul.f32 1.442695, %v1634_v0  ;;  %v2523_v42 = vadd.f32 %v533_v60, %v2393_v21 }
 0x139   :  { %v2013_v55 = vpop.eup %2012  ;;  %2038 = vrcp.f32 %v804_v34  ;;  %v805_v40 = vadd.f32 1.0, %v2011_v45  ;;  %2849 = vst [vmem:[#allocation20_spill] sm:$0xff] %v2519_v25  ;;  %v722_v34 = vmul.f32 1.442695, %v1633_v5  ;;  %v2527_v45 = vadd.f32 %v432_v4, %v2396_v22 }
 0x13a   :  { %v2497_v47 = vpop.eup %2014  ;;  %2040 = vrcp.f32 %v806_v38  ;;  %v807_v61 = vadd.f32 1.0, %v2013_v55  ;;  %2850 = vst [vmem:[#allocation21_spill] sm:$0xff] %v2523_v42  ;;  %v2533_v53 = vadd.f32 %v535_v19, %v2399_v23  ;;  %v436_v55 = vpop.f32.mrf.mxu0  ;;  %v728_v56 = vmul.f32 1.442695, %v1636_v24 }
 0x13b   :  { %v2503_v52 = vpop.eup %2016  ;;  %2042 = vrcp.f32 %v805_v40  ;;  %v1640_v60 = vmul.f32 -1.702, %v2519_v25  ;;  %v1642_v5 = vmul.f32 -1.702, %v2523_v42  ;;  %v1641_v4 = vmul.f32 -1.702, %v2527_v45 }
 0x13c   :  { %v2509_v63 = vpop.eup %2018  ;;  %2044 = vrcp.f32 %v807_v61  ;;  %v539_v61 = vpop.f32.mrf.mxu1  ;;  %v1643_v24 = vmul.f32 -1.702, %v2533_v53 }
 0x13d   :  { %v2515_v14 = vpop.eup %2020  ;;  %2046 = vpow2.f32 %v712_v28  ;;  %v1637_v28 = vmul.f32 -1.702, %v2507_v7  ;;  %v438_v12 = vpop.f32.mrf.mxu0  ;;  %v740_v42 = vmul.f32 1.442695, %v1642_v5  ;;  %v2567_v5 = vmul.f32 %v2497_v47, %v2402_v26 }
 0x13e   :  { %v2023_v31 = vpop.eup %2022  ;;  %2048 = vpow2.f32 %v716_v43  ;;  %v1639_v43 = vmul.f32 -1.702, %v2513_v13  ;;  %v2585_v26 = vmul.f32 %v2515_v14, %v2413_v33 }
 0x13f   :  { %v2025_v30 = vpop.eup %2024  ;;  %2050 = vpow2.f32 %v714_v3  ;;  %v732_v3 = vmul.f32 1.442695, %v1638_v36  ;;  %v730_v11 = vmul.f32 1.442695, %v1637_v28  ;;  %v541_v36 = vpop.f32.mrf.mxu1  ;;  %v738_v28 = vmul.f32 1.442695, %v1641_v4 }
 0x140   :  { %v2529_v38 = vpop.eup %2026  ;;  %2052 = vpow2.f32 %v718_v10  ;;  %v2558_v51 = vmul.f32 %v2023_v31, %v2417_v39  ;;  %v2574_v39 = vmul.f32 %v2503_v52, %v2405_v27  ;;  %v2577_v31 = vmul.f32 %v2025_v30, %v2421_v41 }
 0x141   :  { %v2535_v40 = vpop.eup %2028  ;;  %2054 = vpow2.f32 %v720_v16  ;;  %v734_v16 = vmul.f32 1.442695, %v1639_v43  ;;  %v440_v43 = vpop.f32.mrf.mxu0 }
 0x142   :  { %v2538_v0 = vpop.eup %2030  ;;  %2056 = vpow2.f32 %v724_v35  ;;  %v736_v35 = vmul.f32 1.442695, %v1640_v60  ;;  %v2563_v60 = vpop.f32.mrf.mxu1 }
 0x143   :  { %v2541_v10 = vpop.eup %2032  ;;  %2058 = vpow2.f32 %v722_v34 }
 0x144   :  { %v2544_v19 = vpop.eup %2034  ;;  %2060 = vpow2.f32 %v726_v48  ;;  %v742_v48 = vmul.f32 1.442695, %v1643_v24  ;;  %v2581_v24 = vmul.f32 %v2509_v63, %v2410_v32  ;;  %v545_v30 = vpop.f32.mrf.mxu1  ;;  %v2592_v32 = vmul.f32 %v2529_v38, %v2425_v46 }
 0x145   :  { %v2547_v2 = vpop.eup %2036  ;;  %2062 = vpow2.f32 %v728_v56  ;;  %v2561_v56 = vadd.f32 %v436_v55, %v2390_v20  ;;  %v2606_v38 = vadd.f32 %v438_v12, %v2396_v22  ;;  %v2647_v27 = vadd.f32 %v545_v30, %v2399_v23 }
 0x146   :  { %v2549_v58 = vpop.eup %2038  ;;  %2064 = vpow2.f32 %v732_v3 }
 0x147   :  { %v2551_v34 = vpop.eup %2040  ;;  %2066 = vpow2.f32 %v730_v11  ;;  %v2570_v11 = vadd.f32 %v539_v61, %v2393_v21  ;;  %v1644_v52 = vmul.f32 -1.702, %v2561_v56 }
 0x148   :  { %v2553_v25 = vpop.eup %2042  ;;  %2068 = vpow2.f32 %v734_v16 }
 0x149   :  { %v2555_v59 = vpop.eup %2044  ;;  %2070 = vpow2.f32 %v736_v35  ;;  %v1646_v63 = vmul.f32 -1.702, %v2570_v11 }
 0x14a   :  { %v2047_v3 = vpop.eup %2046  ;;  %2072 = vpow2.f32 %v740_v42  ;;  %v442_v42 = vpop.f32.mrf.mxu0 }
 0x14b   :  { %v2049_v4 = vpop.eup %2048  ;;  %v808_v55 = vadd.f32 1.0, %v2047_v3  ;;  %2074 = vpow2.f32 %v738_v28  ;;  %v2608_v28 = vmul.f32 1.442695, %v1644_v52 }
 0x14c   :  { %v2051_v16 = vpop.eup %2050  ;;  %v810_v47 = vadd.f32 1.0, %v2049_v4  ;;  %2076 = vpow2.f32 %v742_v48  ;;  %v2599_v48 = vmul.f32 %v2535_v40, %v2429_v49  ;;  %v2611_v49 = vadd.f32 %v541_v36, %v2399_v23  ;;  %v549_v40 = vpop.f32.mrf.mxu1 }
 0x14d   :  { %v2053_v61 = vpop.eup %2052  ;;  %2078 = vrcp.f32 %v808_v55  ;;  %v809_v41 = vadd.f32 1.0, %v2051_v16  ;;  %v2603_v55 = vmul.f32 %v2538_v0, %v2433_v54  ;;  %v446_v16 = vpop.f32.mrf.mxu0  ;;  %v2615_v54 = vmul.f32 %v2541_v10, %v2437_v57 }
 0x14e   :  { %v2055_v35 = vpop.eup %2054  ;;  %2080 = vrcp.f32 %v810_v47  ;;  %v811_v33 = vadd.f32 1.0, %v2053_v61  ;;  %v2624_v36 = vadd.f32 %v440_v43, %v2390_v20  ;;  %v1645_v10 = vmul.f32 -1.702, %v2606_v38  ;;  %v551_v43 = vpop.f32.mrf.mxu1 }
 0x14f   :  { %v2057_v14 = vpop.eup %2056  ;;  %2082 = vrcp.f32 %v809_v41  ;;  %v812_v3 = vadd.f32 1.0, %v2055_v35  ;;  %v2617_v35 = vmul.f32 1.442695, %v1646_v63  ;;  %v448_v63 = vpop.f32.mrf.mxu0 }
 0x150   :  { %v2059_v4 = vpop.eup %2058  ;;  %2084 = vrcp.f32 %v811_v33  ;;  %v814_v46 = vadd.f32 1.0, %v2057_v14  ;;  %v2621_v33 = vmul.f32 %v2544_v19, %v2441_v62  ;;  %v1647_v62 = vmul.f32 -1.702, %v2611_v49 }
 0x151   :  { %v2061_v47 = vpop.eup %2060  ;;  %2086 = vrcp.f32 %v812_v3  ;;  %v813_v61 = vadd.f32 1.0, %v2059_v4  ;;  %v2628_v3 = vmul.f32 %v2547_v2, %v2445_v1  ;;  %v2634_v19 = vadd.f32 %v2563_v60, %v2393_v21 }
 0x152   :  { %v2063_v41 = vpop.eup %2062  ;;  %2088 = vrcp.f32 %v814_v46  ;;  %v815_v0 = vadd.f32 1.0, %v2061_v47  ;;  %v2638_v1 = vmul.f32 %v2549_v58, %v2449_v6  ;;  %v1017_v60 = vpack.c.bf16 %v2592_v32, %v2581_v24  ;;  %v450_v6 = vpop.f32.mrf.mxu0 }
 0x153   :  { %v2065_v12 = vpop.eup %2064  ;;  %2090 = vrcp.f32 %v813_v61  ;;  %v816_v52 = vadd.f32 1.0, %v2063_v41  ;;  %v2641_v61 = vadd.f32 %v442_v42, %v2396_v22  ;;  %v1019_v58 = vpack.c.bf16 %v2599_v48, %v2585_v26 }
 0x154   :  { %v2067_v14 = vpop.eup %2066  ;;  %2092 = vrcp.f32 %v815_v0  ;;  %v818_v57 = vadd.f32 1.0, %v2065_v12  ;;  %v1648_v12 = vmul.f32 -1.702, %v2624_v36  ;;  %1338 = vmatprep.mubr.bf16.mxu0 %v1017_v60  ;;  %v2853_v26 = vpack.c.bf16 %v2558_v51, %v2567_v5  ;;  %v452_v5 = vpop.f32.mrf.mxu0 }
 0x155   :  { %v2069_v4 = vpop.eup %2068  ;;  %2094 = vrcp.f32 %v816_v52  ;;  %v817_v46 = vadd.f32 1.0, %v2067_v14  ;;  %v1649_v30 = vmul.f32 -1.702, %v2641_v61  ;;  %1427 = vmatprep.mubr.bf16.mxu1 %v1019_v58  ;;  %v2855_v60 = vpack.c.bf16 %v2577_v31, %v2574_v39 }
 0x156   :  { %v2071_v47 = vpop.eup %2070  ;;  %2096 = vrcp.f32 %v818_v57  ;;  %v819_v2 = vadd.f32 1.0, %v2069_v4  ;;  %v1650_v4 = vmul.f32 -1.702, %v2634_v19  ;;  %1339 = vmatmul.mubr.bf16.vlgmr.msra.gmra.mxu0 %v2853_v26  ;;  %v1651_v51 = vmul.f32 -1.702, %v2647_v27 }
 0x157   :  { %v2073_v41 = vpop.eup %2072  ;;  %2098 = vrcp.f32 %v817_v46  ;;  %v820_v0 = vadd.f32 1.0, %v2071_v47  ;;  %v2653_v46 = vadd.f32 %v446_v16, %v2390_v20  ;;  %v553_v47 = vpop.f32.mrf.mxu1  ;;  %v746_v16 = vmul.f32 1.442695, %v1645_v10  ;;  %1428 = vmatmul.mubr.bf16.vlgmr.msra.gmra.mxu1 %v2855_v60 }
 0x158   :  { %v2075_v52 = vpop.eup %2074  ;;  %2100 = vrcp.f32 %v819_v2  ;;  %v822_v14 = vadd.f32 1.0, %v2073_v41  ;;  %v2659_v2 = vadd.f32 %v549_v40, %v2393_v21  ;;  %v2667_v41 = vadd.f32 %v448_v63, %v2396_v22 }
 0x159   :  { %v2077_v42 = vpop.eup %2076  ;;  %2102 = vrcp.f32 %v820_v0  ;;  %v821_v57 = vadd.f32 1.0, %v2075_v52  ;;  %2851 = vst [vmem:[#allocation22_spill] sm:$0xff] %v2653_v46  ;;  %v2670_v0 = vadd.f32 %v551_v43, %v2399_v23  ;;  %v750_v52 = vmul.f32 1.442695, %v1647_v62  ;;  %v555_v39 = vpop.f32.mrf.mxu1 }
 0x15a   :  { %v2655_v24 = vpop.eup %2078  ;;  %2104 = vrcp.f32 %v822_v14  ;;  %v823_v32 = vadd.f32 1.0, %v2077_v42  ;;  %2852 = vst [vmem:[#allocation23_spill] sm:$0xff] %v2659_v2  ;;  %v752_v14 = vmul.f32 1.442695, %v1648_v12  ;;  %v1652_v10 = vmul.f32 -1.702, %v2653_v46 }
 0x15b   :  { %v2664_v48 = vpop.eup %2080  ;;  %2106 = vrcp.f32 %v821_v57  ;;  %2854 = vst [vmem:[#allocation24_spill] sm:$0xff] %v2670_v0  ;;  %v2679_v63 = vadd.f32 %v450_v6, %v2390_v20  ;;  %v2682_v43 = vadd.f32 %v553_v47, %v2393_v21  ;;  %v756_v62 = vmul.f32 1.442695, %v1650_v4 }
 0x15c   :  { %v2083_v40 = vpop.eup %2082  ;;  %2108 = vrcp.f32 %v823_v32  ;;  %v754_v12 = vmul.f32 1.442695, %v1649_v30  ;;  %v1654_v42 = vmul.f32 -1.702, %v2659_v2  ;;  %v1655_v6 = vmul.f32 -1.702, %v2670_v0 }
 0x15d   :  { %v2085_v58 = vpop.eup %2084  ;;  %2110 = vpow2.f32 %v2608_v28  ;;  %2856 = vst [vmem:[#allocation25_spill] sm:$0xff] %v2682_v43  ;;  %v1653_v28 = vmul.f32 -1.702, %v2667_v41  ;;  %v2693_v32 = vadd.f32 %v452_v5, %v2396_v22  ;;  %v973_v26 = vmul.f32 %v2553_v25, %v2457_v15 }
 0x15e   :  { %v2684_v31 = vpop.eup %2086  ;;  %2112 = vpow2.f32 %v2617_v35  ;;  %v758_v35 = vmul.f32 1.442695, %v1651_v51  ;;  %v2698_v4 = vadd.f32 %v555_v39, %v2399_v23  ;;  %v760_v60 = vmul.f32 1.442695, %v1652_v10 }
 0x15f   :  { %v2688_v57 = vpop.eup %2088  ;;  %2114 = vpow2.f32 %v746_v16  ;;  %v1656_v16 = vmul.f32 -1.702, %v2679_v63  ;;  %v1658_v2 = vmul.f32 -1.702, %v2682_v43  ;;  %v974_v5 = vmul.f32 %v2551_v34, %v2453_v9 }
 0x160   :  { %v2091_v47 = vpop.eup %2090  ;;  %2116 = vpow2.f32 %v750_v52  ;;  %v975_v15 = vmul.f32 %v2555_v59, %v2461_v18  ;;  %v764_v25 = vmul.f32 1.442695, %v1654_v42  ;;  %v762_v51 = vmul.f32 1.442695, %v1653_v28 }
 0x161   :  { %v2093_v30 = vpop.eup %2092  ;;  %2118 = vpow2.f32 %v752_v14  ;;  %v766_v14 = vmul.f32 1.442695, %v1655_v6  ;;  %v1657_v10 = vmul.f32 -1.702, %v2693_v32  ;;  %v981_v46 = vmul.f32 %v2091_v47, %v2487_v44  ;;  %v456_v6 = vpop.f32.mrf.mxu0 }
 0x162   :  { %v2702_v0 = vpop.eup %2094  ;;  %2120 = vpow2.f32 %v756_v62  ;;  %v983_v43 = vmul.f32 %v2093_v30, %v2491_v50  ;;  %v1659_v9 = vmul.f32 -1.702, %v2698_v4  ;;  %v768_v18 = vmul.f32 1.442695, %v1656_v16 }
 0x163   :  { %v2708_v52 = vpop.eup %2096  ;;  %2122 = vpow2.f32 %v754_v12  ;;  %v772_v59 = vmul.f32 1.442695, %v1658_v2  ;;  %v1021_v62 = vpack.c.bf16 %v973_v26, %v2621_v33  ;;  %v977_v12 = vmul.f32 %v2083_v40, %v2473_v8 }
 0x164   :  { %v2099_v39 = vpop.eup %2098  ;;  %2124 = vpow2.f32 %v758_v35  ;;  %v979_v28 = vmul.f32 %v2085_v58, %v2477_v17  ;;  %v1023_v44 = vpack.c.bf16 %v975_v15, %v2628_v3  ;;  %v770_v47 = vmul.f32 1.442695, %v1657_v10  ;;  %v559_v35 = vpop.f32.mrf.mxu1 }
 0x165   :  { %v2101_v34 = vpop.eup %2100  ;;  %2126 = vpow2.f32 %v760_v60  ;;  %1346 = vmatprep.mubr.bf16.mxu0 %v1021_v62  ;;  %v1020_v2 = vpack.c.bf16 %v2638_v1, %v2603_v55  ;;  %v1022_v33 = vpack.c.bf16 %v974_v5, %v2615_v54  ;;  %v774_v8 = vmul.f32 1.442695, %v1659_v9  ;;  %v458_v5 = vpop.f32.mrf.mxu0  ;;  %v2858_v9 = vld [vmem:[#allocation17_spill] sm:$0xff] }
 0x166   :  { %v2715_v42 = vpop.eup %2102  ;;  %2128 = vpow2.f32 %v764_v25  ;;  %1435 = vmatprep.mubr.bf16.mxu1 %v1023_v44  ;;  %v1025_v17 = vpack.c.bf16 %v981_v46, %v977_v12  ;;  %v1027_v40 = vpack.c.bf16 %v983_v43, %v979_v28  ;;  %v2726_v3 = vadd.f32 %v456_v6, %v2390_v20 }
 0x167   :  { %v2720_v50 = vpop.eup %2104  ;;  %2130 = vpow2.f32 %v762_v51  ;;  %1347 = vmatmul.mubr.bf16.gmra.mxu0 %v1020_v2  ;;  %1436 = vmatmul.mubr.bf16.gmra.mxu1 %v1022_v33  ;;  %v2731_v54 = vadd.f32 %v559_v35, %v2393_v21  ;;  %v980_v46 = vmul.f32 %v2684_v31, %v2480_v29  ;;  %v982_v43 = vmul.f32 %v2688_v57, %v2484_v37  ;;  %v561_v37 = vpop.f32.mrf.mxu1 }
 0x168   :  { %v2107_v26 = vpop.eup %2106  ;;  %2132 = vpow2.f32 %v766_v14  ;;  %1354 = vmatprep.mubr.bf16.mxu0 %v1025_v17  ;;  %1443 = vmatprep.mubr.bf16.mxu1 %v1027_v40  ;;  %v2857_v14 = vld [vmem:[#allocation16_spill] sm:$0xff]  ;;  %v978_v29 = vmul.f32 %v2664_v48, %v2858_v9  ;;  %v2744_v6 = vadd.f32 %v458_v5, %v2396_v22 }
 0x169   :  { %v2109_v58 = vpop.eup %2108  ;;  %2134 = vpow2.f32 %v768_v18  ;;  %v989_v60 = vmul.f32 %v2107_v26, %v2527_v45  ;;  %v985_v45 = vmul.f32 %v2099_v39, %v2507_v7  ;;  %v976_v10 = vmul.f32 %v2655_v24, %v2857_v14  ;;  %v460_v39 = vpop.f32.mrf.mxu0  ;;  %v2859_v40 = vld [vmem:[#allocation20_spill] sm:$0xff] }
 0x16a   :  { %v2111_v30 = vpop.eup %2110  ;;  %v991_v55 = vmul.f32 %v2109_v58, %v2533_v53  ;;  %2136 = vpow2.f32 %v772_v59  ;;  %v987_v53 = vmul.f32 %v2101_v34, %v2513_v13  ;;  %v1026_v12 = vpack.c.bf16 %v982_v43, %v978_v29  ;;  %v563_v35 = vpop.f32.mrf.mxu1 }
 0x16b   :  { %v2113_v1 = vpop.eup %2112  ;;  %v824_v16 = vadd.f32 1.0, %v2111_v30  ;;  %2138 = vpow2.f32 %v770_v47  ;;  %v1029_v59 = vpack.c.bf16 %v989_v60, %v985_v45  ;;  %v1024_v34 = vpack.c.bf16 %v980_v46, %v976_v10  ;;  %v2860_v30 = vld [vmem:[#allocation21_spill] sm:$0xff]  ;;  %v2861_v45 = vld [vmem:[#allocation18_spill] sm:$0xff] }
 0x16c   :  { %v2115_v15 = vpop.eup %2114  ;;  %v826_v25 = vadd.f32 1.0, %v2113_v1  ;;  %2140 = vpow2.f32 %v774_v8  ;;  %v1031_v62 = vpack.c.bf16 %v991_v55, %v987_v53  ;;  %v1660_v47 = vmul.f32 -1.702, %v2726_v3  ;;  %v462_v1 = vpop.f32.mrf.mxu0 }
 0x16d   :  { %v2117_v51 = vpop.eup %2116  ;;  %2142 = vrcp.f32 %v824_v16  ;;  %v825_v31 = vadd.f32 1.0, %v2115_v15  ;;  %v1662_v26 = vmul.f32 -1.702, %v2731_v54  ;;  %v2749_v8 = vadd.f32 %v561_v37, %v2399_v23 }
 0x16e   :  { %v2119_v57 = vpop.eup %2118  ;;  %2144 = vrcp.f32 %v826_v25  ;;  %v827_v18 = vadd.f32 1.0, %v2117_v51  ;;  %v988_v58 = vmul.f32 %v2715_v42, %v2859_v40  ;;  %v990_v60 = vmul.f32 %v2720_v50, %v2860_v30  ;;  %v2862_v25 = vld [vmem:[#allocation19_spill] sm:$0xff]  ;;  %v565_v51 = vpop.f32.mrf.mxu1 }
 0x16f   :  { %v2121_v7 = vpop.eup %2120  ;;  %2146 = vrcp.f32 %v825_v31  ;;  %v828_v13 = vadd.f32 1.0, %v2119_v57  ;;  %1355 = vmatmul.mubr.bf16.gmra.mxu0 %v1024_v34  ;;  %1444 = vmatmul.mubr.bf16.gmra.mxu1 %v1026_v12  ;;  %v1661_v16 = vmul.f32 -1.702, %v2744_v6  ;;  %v2757_v5 = vadd.f32 %v460_v39, %v2390_v20 }
 0x170   :  { %v2123_v28 = vpop.eup %2122  ;;  %2148 = vrcp.f32 %v827_v18  ;;  %v830_v24 = vadd.f32 1.0, %v2121_v7  ;;  %1362 = vmatprep.mubr.bf16.mxu0 %v1029_v59  ;;  %1451 = vmatprep.mubr.bf16.mxu1 %v1031_v62  ;;  %v984_v53 = vmul.f32 %v2702_v0, %v2861_v45  ;;  %v986_v42 = vmul.f32 %v2708_v52, %v2862_v25 }
 0x171   :  { %v2125_v48 = vpop.eup %2124  ;;  %2150 = vrcp.f32 %v828_v13  ;;  %v829_v44 = vadd.f32 1.0, %v2123_v28  ;;  %v2764_v9 = vadd.f32 %v563_v35, %v2393_v21  ;;  %v2767_v29 = vadd.f32 %v462_v1, %v2396_v22 }
 0x172   :  { %v2127_v2 = vpop.eup %2126  ;;  %2152 = vrcp.f32 %v830_v24  ;;  %v831_v33 = vadd.f32 1.0, %v2125_v48  ;;  %v1028_v37 = vpack.c.bf16 %v988_v58, %v984_v53  ;;  %v1030_v0 = vpack.c.bf16 %v990_v60, %v986_v42 }
 0x173   :  { %v2129_v17 = vpop.eup %2128  ;;  %2154 = vrcp.f32 %v829_v44  ;;  %v832_v55 = vadd.f32 1.0, %v2127_v2  ;;  %v1663_v18 = vmul.f32 -1.702, %v2749_v8  ;;  %v2771_v59 = vadd.f32 %v565_v51, %v2399_v23 }
 0x174   :  { %v2131_v46 = vpop.eup %2130  ;;  %2156 = vrcp.f32 %v831_v33  ;;  %v834_v43 = vadd.f32 1.0, %v2129_v17  ;;  %v776_v7 = vmul.f32 1.442695, %v1660_v47  ;;  %v1664_v22 = vmul.f32 -1.702, %v2757_v5 }
 0x175   :  { %v2133_v15 = vpop.eup %2132  ;;  %2158 = vrcp.f32 %v832_v55  ;;  %v833_v50 = vadd.f32 1.0, %v2131_v46  ;;  %v780_v34 = vmul.f32 1.442695, %v1662_v26  ;;  %v1666_v12 = vmul.f32 -1.702, %v2764_v9 }
 0x176   :  { %v2135_v14 = vpop.eup %2134  ;;  %2160 = vrcp.f32 %v834_v43  ;;  %v835_v10 = vadd.f32 1.0, %v2133_v15  ;;  %v778_v24 = vmul.f32 1.442695, %v1661_v16  ;;  %v1665_v23 = vmul.f32 -1.702, %v2767_v29 }
 0x177   :  { %v2137_v20 = vpop.eup %2136  ;;  %2162 = vrcp.f32 %v833_v50  ;;  %v836_v31 = vadd.f32 1.0, %v2135_v14  ;;  %1363 = vmatmul.mubr.bf16.gmra.mxu0 %v1028_v37  ;;  %1452 = vmatmul.mubr.bf16.gmra.mxu1 %v1030_v0  ;;  %v782_v44 = vmul.f32 1.442695, %v1663_v18  ;;  %v1667_v47 = vmul.f32 -1.702, %v2771_v59  ;;  %v2865_v18 = vld [vmem:[#allocation24_spill] sm:$0xff] }
 0x178   :  { %v2139_v57 = vpop.eup %2138  ;;  %2164 = vrcp.f32 %v835_v10  ;;  %v838_v52 = vadd.f32 1.0, %v2137_v20  ;;  %v784_v2 = vmul.f32 1.442695, %v1664_v22  ;;  %v788_v17 = vmul.f32 1.442695, %v1666_v12  ;;  %v2863_v20 = vld [vmem:[#allocation25_spill] sm:$0xff] }
 0x179   :  { %v2141_v62 = vpop.eup %2140  ;;  %2166 = vrcp.f32 %v836_v31  ;;  %v837_v21 = vadd.f32 1.0, %v2139_v57  ;;  %v786_v26 = vmul.f32 1.442695, %v1665_v23  ;;  %v790_v60 = vmul.f32 1.442695, %v1667_v47  ;;  %v2864_v57 = vld [vmem:[#allocation22_spill] sm:$0xff] }
 0x17a   :  { %v2143_v13 = vpop.eup %2142  ;;  %2168 = vrcp.f32 %v838_v52  ;;  %v839_v39 = vadd.f32 1.0, %v2141_v62  ;;  %v2866_v22 = vld [vmem:[#allocation23_spill] sm:$0xff] }
 0x17b   :  { %v2145_v28 = vpop.eup %2144  ;;  %2170 = vrcp.f32 %v837_v21  ;;  %v992_v15 = vmul.f32 %v2143_v13, %v2561_v56 }
 0x17c   :  { %v2147_v48 = vpop.eup %2146  ;;  %2172 = vrcp.f32 %v839_v39 }
 0x17d   :  { %v2149_v35 = vpop.eup %2148  ;;  %2174 = vpow2.f32 %v776_v7  ;;  %v993_v1 = vmul.f32 %v2147_v48, %v2606_v38 }
 0x17e   :  { %v2151_v33 = vpop.eup %2150  ;;  %2176 = vpow2.f32 %v780_v34  ;;  %v995_v45 = vmul.f32 %v2149_v35, %v2611_v49 }
 0x17f   :  { %v2153_v40 = vpop.eup %2152  ;;  %2178 = vpow2.f32 %v778_v24  ;;  %v996_v30 = vmul.f32 %v2151_v33, %v2624_v36  ;;  %v994_v36 = vmul.f32 %v2145_v28, %v2570_v11 }
 0x180   :  { %v2155_v58 = vpop.eup %2154  ;;  %2180 = vpow2.f32 %v782_v44  ;;  %v998_v46 = vmul.f32 %v2153_v40, %v2634_v19 }
 0x181   :  { %v2157_v55 = vpop.eup %2156  ;;  %v997_v43 = vmul.f32 %v2155_v58, %v2641_v61  ;;  %2182 = vpow2.f32 %v784_v2  ;;  %v1032_v19 = vpack.c.bf16 %v996_v30, %v992_v15 }
 0x182   :  { %v2159_v16 = vpop.eup %2158  ;;  %v999_v53 = vmul.f32 %v2157_v55, %v2647_v27  ;;  %2184 = vpow2.f32 %v788_v17  ;;  %v1034_v61 = vpack.c.bf16 %v998_v46, %v994_v36 }
 0x183   :  { %v2161_v25 = vpop.eup %2160  ;;  %2186 = vpow2.f32 %v786_v26  ;;  %v1033_v42 = vpack.c.bf16 %v997_v43, %v993_v1  ;;  %v1000_v52 = vmul.f32 %v2159_v16, %v2864_v57 }
 0x184   :  { %v2163_v50 = vpop.eup %2162  ;;  %2188 = vpow2.f32 %v790_v60  ;;  %v1035_v38 = vpack.c.bf16 %v999_v53, %v995_v45  ;;  %v1002_v13 = vmul.f32 %v2161_v25, %v2866_v22 }
 0x185   :  { %v2165_v51 = vpop.eup %2164  ;;  %1370 = vmatprep.mubr.bf16.mxu0 %v1033_v42  ;;  %v1001_v11 = vmul.f32 %v2163_v50, %v2667_v41 }
 0x186   :  { %v2167_v14 = vpop.eup %2166  ;;  %1459 = vmatprep.mubr.bf16.mxu1 %v1035_v38  ;;  %1371 = vmatmul.mubr.bf16.gmra.mxu0 %v1032_v19  ;;  %v1003_v62 = vmul.f32 %v2165_v51, %v2865_v18 }
 0x187   :  { %v2169_v56 = vpop.eup %2168  ;;  %1460 = vmatmul.mubr.bf16.gmra.mxu1 %v1034_v61  ;;  %v1004_v27 = vmul.f32 %v2167_v14, %v2679_v63  ;;  %v2867_v61 = vld [vmem:[#allocation15_spill] sm:$0xff] }
 0x188   :  { %v2171_v49 = vpop.eup %2170  ;;  %v1006_v31 = vmul.f32 %v2169_v56, %v2863_v20 }
 0x189   :  { %v2173_v10 = vpop.eup %2172  ;;  %v1005_v37 = vmul.f32 %v2171_v49, %v2693_v32  ;;  %v1036_v41 = vpack.c.bf16 %v1004_v27, %v1000_v52 }
 0x18a   :  { %v2175_v0 = vpop.eup %2174  ;;  %v1007_v21 = vmul.f32 %v2173_v10, %v2698_v4  ;;  %v1038_v32 = vpack.c.bf16 %v1006_v31, %v1002_v13 }
 0x18b   :  { %v2177_v7 = vpop.eup %2176  ;;  %v840_v39 = vadd.f32 1.0, %v2175_v0  ;;  %v1037_v34 = vpack.c.bf16 %v1005_v37, %v1001_v11 }
 0x18c   :  { %v2179_v63 = vpop.eup %2178  ;;  %v842_v12 = vadd.f32 1.0, %v2177_v7  ;;  %v1039_v28 = vpack.c.bf16 %v1007_v21, %v1003_v62 }
 0x18d   :  { %v2181_v24 = vpop.eup %2180  ;;  %2190 = vrcp.f32 %v840_v39  ;;  %v841_v23 = vadd.f32 1.0, %v2179_v63  ;;  %1378 = vmatprep.mubr.bf16.mxu0 %v1037_v34 }
 0x18e   :  { %v2183_v48 = vpop.eup %2182  ;;  %2192 = vrcp.f32 %v842_v12  ;;  %v843_v44 = vadd.f32 1.0, %v2181_v24  ;;  %1467 = vmatprep.mubr.bf16.mxu1 %v1039_v28  ;;  %1379 = vmatmul.mubr.bf16.gmra.mxu0 %v1036_v41 }
 0x18f   :  { %v2185_v4 = vpop.eup %2184  ;;  %2194 = vrcp.f32 %v841_v23  ;;  %v844_v47 = vadd.f32 1.0, %v2183_v48  ;;  %1468 = vmatmul.mubr.bf16.gmra.mxu1 %v1038_v32 }
 0x190   :  { %v2187_v35 = vpop.eup %2186  ;;  %2196 = vrcp.f32 %v843_v44  ;;  %v846_v2 = vadd.f32 1.0, %v2185_v4 }
 0x191   :  { %v2189_v33 = vpop.eup %2188  ;;  %2198 = vrcp.f32 %v844_v47  ;;  %v845_v17 = vadd.f32 1.0, %v2187_v35 }
 0x192   :  { %2200 = vrcp.f32 %v846_v2  ;;  %v847_v40 = vadd.f32 1.0, %v2189_v33 }
 0x193   :  { %2202 = vrcp.f32 %v845_v17 }
 0x194   :  { %2204 = vrcp.f32 %v847_v40 }
 0x19a   :  { %v2191_v26 = vpop.eup %2190 }
 0x19b   :  { %v2193_v58 = vpop.eup %2192  ;;  %v1008_v25 = vmul.f32 %v2191_v26, %v2726_v3 }
 0x19c   :  { %v2195_v30 = vpop.eup %2194  ;;  %v1010_v50 = vmul.f32 %v2193_v58, %v2731_v54 }
 0x19d   :  { %v2197_v60 = vpop.eup %2196  ;;  %v1009_v15 = vmul.f32 %v2195_v30, %v2744_v6  ;;  %v1108_v6 = vld [vmem:[%s2831_s4] sm:$0x1]  ;;  %s2323_s4 = smov [#allocation10]  }
 0x19e   :  { %v2199_v55 = vpop.eup %2198  ;;  %v1011_v36 = vmul.f32 %v2197_v60, %v2749_v8  ;;  %s1559_s15 = sshll.u32 %s2323_s4, 4  ;;  %s1560_s15 = int_to_ptr.vmem [resolvable:$true] %s1559_s15 }
 0x19f   :  { %v2201_v1 = vpop.eup %2200  ;;  %v1012_v43 = vmul.f32 %v2199_v55, %v2757_v5  ;;  %s2286_s16 = scalar_lea.vmem %s1560_s15, 896  ;;  %p2291_p7 = scmp.lt.s32.totalorder %s1560_s15, %s1560_s15 }
 0x1a0   :  { %v2203_v46 = vpop.eup %2202  ;;  %v1014_v45 = vmul.f32 %v2201_v1, %v2764_v9  ;;  %v1109_v9 = vunpack.c.l.bf16 %v1108_v6  ;;  %p2287_p6 = scmp.ne.s32.totalorder %s1560_s15, %s2286_s16  ;;  %p2292_p8 = scmp.lt.s32.totalorder %s2286_s16, %s2286_s16 }
 0x1a1   :  { %v2205_v16 = vpop.eup %2204  ;;  %v1013_v53 = vmul.f32 %v2203_v46, %v2767_v29  ;;  %v1040_v51 = vpack.c.bf16 %v1012_v43, %v1008_v25 }
 0x1a2   :  { %v1015_v42 = vmul.f32 %v2205_v16, %v2771_v59  ;;  %v1042_v5 = vpack.c.bf16 %v1014_v45, %v1010_v50  ;;  %v2805_v59 = vrot.slane %v1109_v9, %v2867_v61  ;;  %p2293_p9 = por %p2292_p8, %p2291_p7 }
 0x1a3   :  { %v1041_v38 = vpack.c.bf16 %v1013_v53, %v1009_v15 }
 0x1a4   :  { %v1043_v19 = vpack.c.bf16 %v1015_v42, %v1011_v36  ;;  %p2294_p10 = pnand %p2293_p9, %p2287_p6 }
 0x1a5   :  { %1386 = vmatprep.mubr.bf16.mxu0 %v1041_v38 }
 0x1a6   :  { %1475 = vmatprep.mubr.bf16.mxu1 %v1043_v19  ;;  %1387 = vmatmul.mubr.bf16.gmra.mxu0 %v1040_v51 }
 0x1a7   :  { %1476 = vmatmul.mubr.bf16.gmra.mxu1 %v1042_v5 }
 0x216   :  { %v1785_v3 = vpop.f32.mrf.mxu0 }
 0x217   :  { %v1843_v29 = vpop.f32.mrf.mxu1 }
 0x218   :  { %v1786_v8 = vpop.f32.mrf.mxu0 }
 0x219   :  { %v1787_v54 = vadd.f32 %v1786_v8, %v1785_v3  ;;  %v1844_v14 = vpop.f32.mrf.mxu1 }
 0x21a   :  { %v1788_v56 = vpop.f32.mrf.mxu0  ;;  %v1845_v31 = vadd.f32 %v1844_v14, %v1843_v29 }
 0x21b   :  { %v1846_v49 = vpop.f32.mrf.mxu1  ;;  %v1341_v10 = vadd.f32 %v1787_v54, %v2805_v59 }
 0x21c   :  { %v1789_v27 = vpop.f32.mrf.mxu0 }
 0x21d   :  { %v1790_v11 = vadd.f32 %v1789_v27, %v1788_v56  ;;  %v1847_v20 = vpop.f32.mrf.mxu1  ;;  %v1430_v57 = vadd.f32 %v1845_v31, %v1341_v10 }
 0x21e   :  { %v1848_v0 = vadd.f32 %v1847_v20, %v1846_v49 }
 0x21f   :  { %v1344_v37 = vadd.f32 %v1790_v11, %v2805_v59 }
 0x221   :  { %v1433_v52 = vadd.f32 %v1848_v0, %v1344_v37 }
 0x223   :  { %v1731_v18 = vpack.c.bf16 %v1433_v52, %v1430_v57 }
 0x225   :  { %1732 = vst [vmem:[#allocation10] sm:$0xff] %v1731_v18  }
 0x227   :  { %v1791_v62 = vpop.f32.mrf.mxu0  ;;  %v1849_v21 = vpop.f32.mrf.mxu1 }
 0x229   :  { %v1792_v7 = vpop.f32.mrf.mxu0  ;;  %v1850_v22 = vpop.f32.mrf.mxu1 }
 0x22a   :  { %v1793_v13 = vadd.f32 %v1792_v7, %v1791_v62  ;;  %v1851_v32 = vadd.f32 %v1850_v22, %v1849_v21 }
 0x22b   :  { %v1794_v39 = vpop.f32.mrf.mxu0  ;;  %v1852_v34 = vpop.f32.mrf.mxu1 }
 0x22c   :  { %v1349_v28 = vadd.f32 %v1793_v13, %v2805_v59 }
 0x22d   :  { %v1795_v63 = vpop.f32.mrf.mxu0  ;;  %v1853_v12 = vpop.f32.mrf.mxu1 }
 0x22e   :  { %v1796_v41 = vadd.f32 %v1795_v63, %v1794_v39  ;;  %v1854_v44 = vadd.f32 %v1853_v12, %v1852_v34  ;;  %v1438_v35 = vadd.f32 %v1851_v32, %v1349_v28 }
 0x22f   :  { %v1797_v24 = vpop.f32.mrf.mxu0  ;;  %v1855_v23 = vpop.f32.mrf.mxu1 }
 0x230   :  { %v1352_v48 = vadd.f32 %v1796_v41, %v2805_v59 }
 0x231   :  { %v1798_v4 = vpop.f32.mrf.mxu0  ;;  %v1856_v47 = vpop.f32.mrf.mxu1 }
 0x232   :  { %v1441_v2 = vadd.f32 %v1854_v44, %v1352_v48  ;;  %v1799_v33 = vadd.f32 %v1798_v4, %v1797_v24  ;;  %v1857_v43 = vadd.f32 %v1856_v47, %v1855_v23 }
 0x233   :  { %v1800_v17 = vpop.f32.mrf.mxu0  ;;  %v1858_v40 = vpop.f32.mrf.mxu1 }
 0x234   :  { %v1736_v26 = vpack.c.bf16 %v1441_v2, %v1438_v35  ;;  %v1357_v60 = vadd.f32 %v1799_v33, %v2805_v59 }
 0x235   :  { %v1801_v58 = vpop.f32.mrf.mxu0  ;;  %v1859_v30 = vpop.f32.mrf.mxu1 }
 0x236   :  { %1763 = vst [vmem:[#allocation10 + $0x8] sm:$0xff] %v1736_v26   ;;  %v1802_v55 = vadd.f32 %v1801_v58, %v1800_v17  ;;  %v1860_v15 = vadd.f32 %v1859_v30, %v1858_v40  ;;  %v1446_v25 = vadd.f32 %v1857_v43, %v1357_v60 }
 0x237   :  { %v1803_v1 = vpop.f32.mrf.mxu0  ;;  %v1861_v46 = vpop.f32.mrf.mxu1 }
 0x238   :  { %v1360_v16 = vadd.f32 %v1802_v55, %v2805_v59 }
 0x239   :  { %v1804_v45 = vpop.f32.mrf.mxu0  ;;  %v1862_v53 = vpop.f32.mrf.mxu1 }
 0x23a   :  { %v1449_v36 = vadd.f32 %v1860_v15, %v1360_v16  ;;  %v1805_v42 = vadd.f32 %v1804_v45, %v1803_v1  ;;  %v1863_v3 = vadd.f32 %v1862_v53, %v1861_v46 }
 0x23b   :  { %v1806_v50 = vpop.f32.mrf.mxu0  ;;  %v1864_v38 = vpop.f32.mrf.mxu1 }
 0x23c   :  { %v1741_v19 = vpack.c.bf16 %v1449_v36, %v1446_v25  ;;  %v1365_v6 = vadd.f32 %v1805_v42, %v2805_v59 }
 0x23d   :  { %v1807_v51 = vpop.f32.mrf.mxu0  ;;  %v1865_v5 = vpop.f32.mrf.mxu1 }
 0x23e   :  { %1764 = vst [vmem:[#allocation10 + $0x10] sm:$0xff] %v1741_v19   ;;  %v1808_v9 = vadd.f32 %v1807_v51, %v1806_v50  ;;  %v1866_v8 = vadd.f32 %v1865_v5, %v1864_v38  ;;  %v1454_v61 = vadd.f32 %v1863_v3, %v1365_v6 }
 0x240   :  { %v1368_v29 = vadd.f32 %v1808_v9, %v2805_v59 }
 0x242   :  { %v1457_v54 = vadd.f32 %v1866_v8, %v1368_v29 }
 0x244   :  { %v1746_v14 = vpack.c.bf16 %v1457_v54, %v1454_v61 }
 0x246   :  { %v1809_v56 = vpop.f32.mrf.mxu0  ;;  %1765 = vst [vmem:[#allocation10 + $0x18] sm:$0xff] %v1746_v14  }
 0x247   :  { %v1867_v49 = vpop.f32.mrf.mxu1 }
 0x248   :  { %v1810_v27 = vpop.f32.mrf.mxu0 }
 0x249   :  { %v1811_v10 = vadd.f32 %v1810_v27, %v1809_v56  ;;  %v1868_v11 = vpop.f32.mrf.mxu1 }
 0x24a   :  { %v1812_v20 = vpop.f32.mrf.mxu0  ;;  %v1869_v62 = vadd.f32 %v1868_v11, %v1867_v49 }
 0x24b   :  { %v1870_v31 = vpop.f32.mrf.mxu1  ;;  %v1373_v0 = vadd.f32 %v1811_v10, %v2805_v59 }
 0x24c   :  { %v1813_v37 = vpop.f32.mrf.mxu0 }
 0x24d   :  { %v1814_v57 = vadd.f32 %v1813_v37, %v1812_v20  ;;  %v1871_v52 = vpop.f32.mrf.mxu1  ;;  %v1462_v39 = vadd.f32 %v1869_v62, %v1373_v0 }
 0x24e   :  { %v1815_v18 = vpop.f32.mrf.mxu0  ;;  %v1872_v7 = vadd.f32 %v1871_v52, %v1870_v31 }
 0x24f   :  { %v1376_v21 = vadd.f32 %v1814_v57, %v2805_v59  ;;  %v1873_v22 = vpop.f32.mrf.mxu1 }
 0x250   :  { %v1816_v13 = vpop.f32.mrf.mxu0 }
 0x251   :  { %v1465_v34 = vadd.f32 %v1872_v7, %v1376_v21  ;;  %v1817_v63 = vadd.f32 %v1816_v13, %v1815_v18  ;;  %v1874_v12 = vpop.f32.mrf.mxu1 }
 0x252   :  { %v1818_v28 = vpop.f32.mrf.mxu0  ;;  %v1875_v4 = vadd.f32 %v1874_v12, %v1873_v22 }
 0x253   :  { %v1751_v41 = vpack.c.bf16 %v1465_v34, %v1462_v39  ;;  %v1876_v24 = vpop.f32.mrf.mxu1  ;;  %v1381_v32 = vadd.f32 %v1817_v63, %v2805_v59 }
 0x254   :  { %v1819_v23 = vpop.f32.mrf.mxu0 }
 0x255   :  { %1766 = vst [vmem:[#allocation10 + $0x20] sm:$0xff] %v1751_v41   ;;  %v1820_v48 = vadd.f32 %v1819_v23, %v1818_v28  ;;  %v1877_v44 = vpop.f32.mrf.mxu1  ;;  %v1470_v2 = vadd.f32 %v1875_v4, %v1381_v32 }
 0x256   :  { %v1878_v35 = vadd.f32 %v1877_v44, %v1876_v24 }
 0x257   :  { %v1384_v47 = vadd.f32 %v1820_v48, %v2805_v59 }
 0x259   :  { %v1473_v33 = vadd.f32 %v1878_v35, %v1384_v47 }
 0x25b   :  { %v1756_v17 = vpack.c.bf16 %v1473_v33, %v1470_v2 }
 0x25d   :  { %1767 = vst [vmem:[#allocation10 + $0x28] sm:$0xff] %v1756_v17  }
 0x266   :  { %v1821_v40 = vpop.f32.mrf.mxu0 }
 0x267   :  { %v1879_v26 = vpop.f32.mrf.mxu1 }
 0x268   :  { %v1822_v58 = vpop.f32.mrf.mxu0 }
 0x269   :  { %v1823_v30 = vadd.f32 %v1822_v58, %v1821_v40  ;;  %v1880_v60 = vpop.f32.mrf.mxu1 }
 0x26a   :  { %v1824_v55 = vpop.f32.mrf.mxu0  ;;  %v1881_v45 = vadd.f32 %v1880_v60, %v1879_v26 }
 0x26b   :  { %v1882_v1 = vpop.f32.mrf.mxu1  ;;  %v1389_v43 = vadd.f32 %v1823_v30, %v2805_v59 }
 0x26c   :  { %v1825_v46 = vpop.f32.mrf.mxu0 }
 0x26d   :  { %v1826_v16 = vadd.f32 %v1825_v46, %v1824_v55  ;;  %v1883_v15 = vpop.f32.mrf.mxu1  ;;  %v1478_v36 = vadd.f32 %v1881_v45, %v1389_v43 }
 0x26e   :  { %v1884_v25 = vadd.f32 %v1883_v15, %v1882_v1 }
 0x26f   :  { %v1392_v53 = vadd.f32 %v1826_v16, %v2805_v59 }
 0x271   :  { %v1481_v42 = vadd.f32 %v1884_v25, %v1392_v53 }
 0x273   :  { %v1761_v50 = vpack.c.bf16 %v1481_v42, %v1478_v36 }
 0x275   :  { %1768 = vst [vmem:[#allocation10 + $0x30] sm:$0xff] %v1761_v50  }
 0x276   :  { %2297 = shalt.err (!%p2294_p10)
}
 0x277   :  { %1565 = dma.vmem_to_hbm [thread:$0]  %s1560_s15, 896, %s2832_s5, [#allocation4], %s2318_s28, %s2318_s28, %s2319_s29  }
 0x278   :  { %2312 = dma.done.wait [#allocation4], 896  }
 0x279   :  { %2313 = vsyncadd [#allocation4], 4294966400 }
 0x27a   :  { %1569 = vsyncpa [#allocation3], 1 }
 0x27b   :  { %1570 = vsyncpa [#allocation6], 1 }
 0x27c   :  { %1571 = vsyncpa [#allocation9], 1 }
 0x27d   :  { %1572 = vsyncpa [#allocation4], 1 }

</bundles_post_ra>
